<compile_context>
chip_gen: v6e
topology: v6e:2x2x1
jax: 0.10.0
libtpu: 0.0.40
codegen_flags: <defaults>
</compile_context>

<pallas_src>
import math
import functools

import jax
import jax.numpy as jnp
from jax.experimental import pallas as pl
from jax.experimental.pallas import tpu as pltpu


# ----------------------------------------------------------------------------
# Helpers
# ----------------------------------------------------------------------------
def _vmem_limit_bytes() -> int:
    """Generation-aware scoped-VMEM budget: ~3/4 of physical VMEM, capped at
    100 MiB (v5e/v6e: 128 MiB -> ~96 MiB; v7x: 64 MiB -> 48 MiB).  Falls back
    to a v7x-safe 48 MiB when the hardware query is unavailable."""
    cap = 64 * 1024 * 1024
    try:
        info = pltpu.get_tpu_info()
        cap = int(getattr(info, "vmem_capacity_bytes", cap) or cap)
    except Exception:
        pass
    return min((cap * 3) // 4, 100 * 1024 * 1024)


def _choose_tile(dim: int, target: int, align: int) -> int:
    """Largest tile <= target that is either the full dim (always layout-legal)
    or an `align`-aligned divisor of dim.  Fails loudly rather than silently
    using a full-extent block on a huge ragged dim (VMEM blow-up on v7x)."""
    if dim <= target:
        return dim
    t = (target // align) * align
    while t >= align:
        if dim % t == 0:
            return t
        t -= align
    # TODO(synk): pad the ragged dim outside the pallas_call instead of failing.
    raise ValueError(f"no {align}-aligned tile <= {target} divides dim {dim}")


def _leading_tile(dim: int, target: int) -> int:
    """Tile for a leading (non-layout-constrained) block axis: the largest
    divisor of `dim` that is <= target."""
    if dim <= target:
        return dim
    for t in range(target, 0, -1):
        if dim % t == 0:
            return t
    return dim


# ----------------------------------------------------------------------------
# Tiled linear kernel: o = x @ W^T + b  (W stays in torch [out, in] layout).
# bf16 MXU operands, f32 VMEM accumulator, bias added at finalize.
# ----------------------------------------------------------------------------
def _linear_kernel(x_ref, w_ref, b_ref, o_ref, acc_ref):
    k = pl.program_id(2)

    @pl.when(k == 0)
    def _init():
        acc_ref[...] = jnp.zeros_like(acc_ref)

    # x: [tm, tk] bf16; w: [tn, tk] bf16 (torch layout). Contract the `in`
    # dims directly -- no transposed weight copy is ever materialized.
    acc_ref[...] += jax.lax.dot_general(
        x_ref[...], w_ref[...],
        dimension_numbers=(((1,), (1,)), ((), ())),
        preferred_element_type=jnp.float32,
    )

    @pl.when(k == pl.num_programs(2) - 1)
    def _finalize():
        o_ref[...] = (acc_ref[...] + b_ref[...]).astype(o_ref.dtype)


def linear_pallas(x, w, b, *, out_dtype, tm=512, tn=512, tk=1024):
    """x: [M, K], w: [N, K] (torch layout), b: [N] -> [M, N] in out_dtype."""
    x = x.astype(jnp.bfloat16)
    w = w.astype(jnp.bfloat16)
    b = b.astype(jnp.float32)
    M, K = x.shape
    N = w.shape[0]
    tm = _choose_tile(M, tm, 16)     # sublane axis (bf16 packing)
    tn = _choose_tile(N, tn, 128)    # lane axis of the output block
    tk = _choose_tile(K, tk, 128)    # lane axis of the operand blocks
    grid = (M // tm, N // tn, K // tk)
    return pl.pallas_call(
        _linear_kernel,
        out_shape=jax.ShapeDtypeStruct((M, N), out_dtype),
        grid=grid,
        in_specs=[
            pl.BlockSpec((tm, tk), lambda i, j, k: (i, k)),
            pl.BlockSpec((tn, tk), lambda i, j, k: (j, k)),
            pl.BlockSpec((1, tn), lambda i, j, k: (0, j)),
        ],
        out_specs=pl.BlockSpec((tm, tn), lambda i, j, k: (i, j)),
        scratch_shapes=[pltpu.VMEM((tm, tn), jnp.float32)],
        compiler_params=pltpu.CompilerParams(
            dimension_semantics=("parallel", "parallel", "arbitrary"),
            vmem_limit_bytes=_vmem_limit_bytes(),
        ),
    )(x, w, b.reshape(1, N))


# ----------------------------------------------------------------------------
# Ring-attention kernel.
#   grid = (B, q_tiles, ring_chunks, k_tiles_per_chunk)
#   q/k/v blocks are read directly from the [B*S, 3, H, Dh] view of the fused
#   QKV projection output (no HBM relayout).  All heads are processed per grid
#   step (per-head batched MXU dots).  Softmax is flash-style *within* each
#   ring chunk (running m/l reset at kj == 0), which reproduces the reference
#   module's per-key-chunk softmax while bounding the score tile to (tq, tk).
# ----------------------------------------------------------------------------
def _ring_attn_kernel(q_ref, k_ref, v_ref, o_ref,
                      qs_sc, m_sc, l_sc, cacc_sc, oacc_sc, *, scale):
    cj = pl.program_id(2)                 # ring (key) chunk index
    kj = pl.program_id(3)                 # key sub-tile within the chunk
    last_cj = pl.num_programs(2) - 1
    last_kj = pl.num_programs(3) - 1

    @pl.when(jnp.logical_and(cj == 0, kj == 0))
    def _init_q_tile():
        # Hoisted once per query tile (the q block is resident across all inner
        # steps): head-leading relayout + 1/sqrt(Dh) scale + bf16 staging.
        qs_sc[...] = (jnp.transpose(q_ref[:, 0], (1, 0, 2)) * scale
                      ).astype(jnp.bfloat16)
        oacc_sc[...] = jnp.zeros_like(oacc_sc)

    @pl.when(kj == 0)
    def _init_chunk():
        m_sc[...] = jnp.full_like(m_sc, -jnp.inf)
        l_sc[...] = jnp.zeros_like(l_sc)
        cacc_sc[...] = jnp.zeros_like(cacc_sc)

    q = qs_sc[...]                                     # [H, tq, Dh] bf16 (scaled)
    k = jnp.transpose(k_ref[:, 0], (1, 0, 2))          # [H, tk, Dh] bf16
    v = jnp.transpose(v_ref[:, 0], (1, 0, 2))          # [H, tk, Dh] bf16

    # Per-head scores on the MXU with f32 accumulation.
    s = jnp.einsum("hqd,hkd->hqk", q, k,
                   preferred_element_type=jnp.float32)  # [H, tq, tk]

    # Flash-style running softmax confined to this ring chunk.
    m_prev = m_sc[...]
    m_new = jnp.maximum(m_prev, jnp.max(s, axis=-1, keepdims=True))
    alpha = jnp.exp(m_prev - m_new)
    p = jnp.exp(s - m_new)
    l_sc[...] = alpha * l_sc[...] + jnp.sum(p, axis=-1, keepdims=True)
    cacc_sc[...] = alpha * cacc_sc[...] + jnp.einsum(
        "hqk,hkd->hqd", p.astype(jnp.bfloat16), v,
        preferred_element_type=jnp.float32)
    m_sc[...] = m_new

    @pl.when(kj == last_kj)
    def _finish_chunk():
        # Per-chunk normalization, summed into the query rows (the reference
        # module normalizes every (q, k_chunk) pair independently).
        oacc_sc[...] += cacc_sc[...] * pl.reciprocal(l_sc[...], approx=True)

    @pl.when(jnp.logical_and(cj == last_cj, kj == last_kj))
    def _finalize():
        # [H, tq, Dh] -> [tq, H, Dh]: output stays in [B*S, H, Dh] layout so
        # the out-projection consumes it with no HBM transpose round trip.
        # TODO(synk): for Dh < 128, fold (H, Dh) into lanes for lane-dense stores.
        o_ref[...] = jnp.transpose(oacc_sc[...], (1, 0, 2)).astype(o_ref.dtype)


def ring_attention_pallas(qkv, B, S, H, Dh, chunk_size, *,
                          q_tile=256, k_tile=256):
    """qkv: [B*S, 3, H, Dh] bf16 -- a free view of the fused QKV projection
    output.  Returns the attention output as [B*S, H, Dh] bf16."""
    assert S % chunk_size == 0, "sequence must be divisible by the ring chunk"
    # TODO(synk): ragged trailing chunks (S % chunk_size != 0) not implemented.
    qkv = qkv.astype(jnp.bfloat16)
    nc = S // chunk_size
    tq = _leading_tile(S, q_tile)             # query sub-tile (pure perf knob)
    tk = _leading_tile(chunk_size, k_tile)    # key sub-tile within a ring chunk
    nq = S // tq
    nk = chunk_size // tk
    kblocks_per_seq = S // tk
    scale = 1.0 / math.sqrt(Dh)

    q_spec = pl.BlockSpec(
        (tq, 1, H, Dh), lambda b, qi, cj, kj: (b * nq + qi, 0, 0, 0))
    # TODO(synk): if profiling shows exposed K/V DMA after the bf16 switch,
    # add pipeline_mode=pl.Buffered(3) to the k/v specs.
    k_spec = pl.BlockSpec(
        (tk, 1, H, Dh),
        lambda b, qi, cj, kj: (b * kblocks_per_seq + cj * nk + kj, 1, 0, 0))
    v_spec = pl.BlockSpec(
        (tk, 1, H, Dh),
        lambda b, qi, cj, kj: (b * kblocks_per_seq + cj * nk + kj, 2, 0, 0))
    o_spec = pl.BlockSpec(
        (tq, H, Dh), lambda b, qi, cj, kj: (b * nq + qi, 0, 0))

    kernel = functools.partial(_ring_attn_kernel, scale=scale)
    return pl.pallas_call(
        kernel,
        out_shape=jax.ShapeDtypeStruct((B * S, H, Dh), jnp.bfloat16),
        grid=(B, nq, nc, nk),
        in_specs=[q_spec, k_spec, v_spec],
        out_specs=o_spec,
        scratch_shapes=[
            pltpu.VMEM((H, tq, Dh), jnp.bfloat16),   # staged, pre-scaled q
            pltpu.VMEM((H, tq, 1), jnp.float32),     # running max (per chunk)
            pltpu.VMEM((H, tq, 1), jnp.float32),     # running sum (per chunk)
            pltpu.VMEM((H, tq, Dh), jnp.float32),    # per-chunk accumulator
            pltpu.VMEM((H, tq, Dh), jnp.float32),    # cross-chunk output acc
        ],
        compiler_params=pltpu.CompilerParams(
            dimension_semantics=("parallel", "parallel", "arbitrary", "arbitrary"),
            vmem_limit_bytes=_vmem_limit_bytes(),
        ),
    )(qkv, qkv, qkv)


# ----------------------------------------------------------------------------
# Full RingSelfAttention forward (fused QKV path, attention_mask=None,
# dropout=0.0).  Only free reshapes between kernels -- no HBM relayouts.
# ----------------------------------------------------------------------------
def ring_self_attention_forward(hidden_states, params, num_heads,
                                world_size=1, chunk_size=None,
                                attn_q_tile=256, attn_k_tile=256):
    # TODO(synk): optional attention_mask [B,1,1,S] additive bias not wired in.
    B, S, hidden = hidden_states.shape
    H = num_heads
    Dh = hidden // H
    if chunk_size is None:
        chunk_size = max(1, S // (2 * world_size))

    # bf16 once at the pallas_call boundaries (weights are re-streamed many
    # times by the matmul grids; K/V are re-read per ring chunk).
    x_bf = hidden_states.astype(jnp.bfloat16).reshape(B * S, hidden)
    qkv_w = params["qkv_w"].astype(jnp.bfloat16)
    out_w = params["out_w"].astype(jnp.bfloat16)
    qkv_b = params["qkv_b"].astype(jnp.float32)
    out_b = params["out_b"].astype(jnp.float32)

    # Fused QKV projection -> bf16 [B*S, 3*hidden]. The [B*S, 3, H, Dh] view is
    # a pure reshape; the attention kernel reads q/k/v blocks straight from it.
    qkv = linear_pallas(x_bf, qkv_w, qkv_b, out_dtype=jnp.bfloat16)
    qkv = qkv.reshape(B * S, 3, H, Dh)

    attn = ring_attention_pallas(qkv, B, S, H, Dh, chunk_size,
                                 q_tile=attn_q_tile, k_tile=attn_k_tile)
    attn = attn.reshape(B * S, hidden)                 # free view, no transpose

    out = linear_pallas(attn, out_w, out_b, out_dtype=jnp.float32)
    return out.reshape(B, S, hidden)


# ----------------------------------------------------------------------------
# Pure-JAX reference (same math: bf16 matmul operands, f32 accumulation,
# per-key-chunk softmax) for the correctness check.
# ----------------------------------------------------------------------------
def reference_forward(hidden_states, params, num_heads,
                      world_size=1, chunk_size=None):
    B, S, hidden = hidden_states.shape
    Dh = hidden // num_heads

    def lin(x, w, b):
        return jnp.dot(x.astype(jnp.bfloat16), w.T.astype(jnp.bfloat16),
                       preferred_element_type=jnp.float32) + b

    qkv = lin(hidden_states.reshape(B * S, hidden),
              params["qkv_w"], params["qkv_b"])
    qkv = qkv.reshape(B, S, 3, num_heads, Dh).transpose(2, 0, 3, 1, 4)
    q, k, v = qkv[0], qkv[1], qkv[2]
    q = q / math.sqrt(Dh)
    if chunk_size is None:
        chunk_size = max(1, S // (2 * world_size))
    nc = S // chunk_size
    out = jnp.zeros((B, num_heads, S, Dh), jnp.float32)
    for j in range(nc):
        kj = k[:, :, j * chunk_size:(j + 1) * chunk_size].astype(jnp.bfloat16)
        vj = v[:, :, j * chunk_size:(j + 1) * chunk_size].astype(jnp.bfloat16)
        s = jnp.einsum("bhqd,bhkd->bhqk", q.astype(jnp.bfloat16), kj,
                       preferred_element_type=jnp.float32)
        p = jax.nn.softmax(s, axis=-1)
        out = out + jnp.einsum("bhqk,bhkd->bhqd", p.astype(jnp.bfloat16), vj,
                               preferred_element_type=jnp.float32)
    out = out.transpose(0, 2, 1, 3).reshape(B * S, hidden)
    out = lin(out, params["out_w"], params["out_b"])
    return out.reshape(B, S, hidden)


if __name__ == "__main__":
    # Small shapes consistent with the module: batch=2, seq=16, hidden=32,
    # heads=4 (default ring chunk = S // 2 = 8).
    B, S, hidden, num_heads = 2, 16, 32, 4

    key = jax.random.PRNGKey(0)
    k1, k2, k3, k4, k5 = jax.random.split(key, 5)
    bound = 1.0 / math.sqrt(hidden)
    params = {
        "qkv_w": jax.random.uniform(k1, (3 * hidden, hidden), jnp.float32,
                                    minval=-bound, maxval=bound),
        "qkv_b": jax.random.uniform(k2, (3 * hidden,), jnp.float32,
                                    minval=-bound, maxval=bound),
        "out_w": jax.random.uniform(k3, (hidden, hidden), jnp.float32,
                                    minval=-bound, maxval=bound),
        "out_b": jax.random.uniform(k4, (hidden,), jnp.float32,
                                    minval=-bound, maxval=bound),
    }
    x = jax.random.normal(k5, (B, S, hidden), jnp.float32)

    ref = reference_forward(x, params, num_heads)

    # Default tiles (k tile == full ring chunk).
    fwd = jax.jit(functools.partial(ring_self_attention_forward,
                                    num_heads=num_heads))
    out = jax.block_until_ready(fwd(x, params))
    assert out.shape == (B, S, hidden)
    assert jnp.allclose(out, ref, rtol=2e-2, atol=2e-2), "mismatch (default tiles)"

    # Also exercise the query/key sub-tiling (flash-style within-chunk) path.
    fwd_tiled = jax.jit(functools.partial(ring_self_attention_forward,
                                          num_heads=num_heads,
                                          attn_q_tile=8, attn_k_tile=4))
    out_tiled = jax.block_until_ready(fwd_tiled(x, params))
    assert jnp.allclose(out_tiled, ref, rtol=2e-2, atol=2e-2), "mismatch (sub-tiled)"

    print("KERNEL_OK")
</pallas_src>

<mosaic_0001>
module attributes {stable_mosaic.version = 11 : i64} {
  func.func @_linear_kernel(%arg0: i32, %arg1: i32, %arg2: i32, %arg3: memref<32x32xbf16, #tpu.memory_space<vmem>>, %arg4: memref<96x32xbf16, #tpu.memory_space<vmem>>, %arg5: memref<1x96xf32, #tpu.memory_space<vmem>>, %arg6: memref<32x96xbf16, #tpu.memory_space<vmem>>, %arg7: memref<32x96xf32, #tpu.memory_space<vmem>>) attributes {dimension_semantics = [#tpu.dimension_semantics<parallel>, #tpu.dimension_semantics<parallel>, #tpu.dimension_semantics<arbitrary>], iteration_bounds = array<i64: 1, 1, 1>, scalar_prefetch = 0 : i64, scratch_operands = 1 : i64, tpu.core_type = #tpu.core_type<tc>, window_params = [{transform_indices = @transform_0, window_bounds = array<i64: 32, 32>}, {transform_indices = @transform_1, window_bounds = array<i64: 96, 32>}, {transform_indices = @transform_2, window_bounds = array<i64: 1, 96>}, {transform_indices = @transform_3, window_bounds = array<i64: 32, 96>}]} {
    %c0_i32 = arith.constant 0 : i32
    %0 = arith.cmpi eq, %arg2, %c0_i32 : i32
    %1 = arith.extui %0 : i1 to i32
    %c0_i32_0 = arith.constant 0 : i32
    %2 = arith.cmpi ne, %1, %c0_i32_0 : i32
    scf.if %2 {
      %cst_10 = arith.constant 0.000000e+00 : f32
      %12 = vector.broadcast %cst_10 : f32 to vector<32x96xf32>
      %c0_11 = arith.constant 0 : index
      %c0_12 = arith.constant 0 : index
      %13 = vector.load %arg7[%c0_11, %c0_12] : memref<32x96xf32, #tpu.memory_space<vmem>>, vector<32x96xf32>
      tpu.vector_store %arg7[%c0_11, %c0_12], %12 {strides = array<i32>} : memref<32x96xf32, #tpu.memory_space<vmem>>, vector<32x96xf32>,
    } else {
    }
    %c0 = arith.constant 0 : index
    %c0_1 = arith.constant 0 : index
    %3 = vector.load %arg7[%c0, %c0_1] : memref<32x96xf32, #tpu.memory_space<vmem>>, vector<32x96xf32>
    %c0_2 = arith.constant 0 : index
    %c0_3 = arith.constant 0 : index
    %4 = vector.load %arg3[%c0_2, %c0_3] : memref<32x32xbf16, #tpu.memory_space<vmem>>, vector<32x32xbf16>
    %c0_4 = arith.constant 0 : index
    %c0_5 = arith.constant 0 : index
    %5 = vector.load %arg4[%c0_4, %c0_5] : memref<96x32xbf16, #tpu.memory_space<vmem>>, vector<96x32xbf16>
    %cst = arith.constant dense<0.000000e+00> : vector<32x96xf32>
    %6 = tpu.matmul %4, %5, %cst {dimension_numbers = #tpu.dot_dimension_numbers<[1], [1], [0], [0], [0, 0, 1, 0], [], []>} : vector<32x32xbf16>, vector<96x32xbf16>, vector<32x96xf32> -> vector<32x96xf32>
    %7 = arith.addf %3, %6 : vector<32x96xf32>
    %c0_6 = arith.constant 0 : index
    %c0_7 = arith.constant 0 : index
    %8 = vector.load %arg7[%c0_6, %c0_7] : memref<32x96xf32, #tpu.memory_space<vmem>>, vector<32x96xf32>
    tpu.vector_store %arg7[%c0_6, %c0_7], %7 {strides = array<i32>} : memref<32x96xf32, #tpu.memory_space<vmem>>, vector<32x96xf32>,
    %c0_i32_8 = arith.constant 0 : i32
    %9 = arith.cmpi eq, %arg2, %c0_i32_8 : i32
    %10 = arith.extui %9 : i1 to i32
    %c0_i32_9 = arith.constant 0 : i32
    %11 = arith.cmpi ne, %10, %c0_i32_9 : i32
    scf.if %11 {
      %c0_10 = arith.constant 0 : index
      %c0_11 = arith.constant 0 : index
      %12 = vector.load %arg7[%c0_10, %c0_11] : memref<32x96xf32, #tpu.memory_space<vmem>>, vector<32x96xf32>
      %c0_12 = arith.constant 0 : index
      %c0_13 = arith.constant 0 : index
      %13 = vector.load %arg5[%c0_12, %c0_13] : memref<1x96xf32, #tpu.memory_space<vmem>>, vector<1x96xf32>
      %14 = vector.broadcast %13 : vector<1x96xf32> to vector<32x96xf32>
      %15 = arith.addf %12, %14 : vector<32x96xf32>
      %16 = arith.truncf %15 : vector<32x96xf32> to vector<32x96xbf16>
      %c0_14 = arith.constant 0 : index
      %c0_15 = arith.constant 0 : index
      %17 = vector.load %arg6[%c0_14, %c0_15] : memref<32x96xbf16, #tpu.memory_space<vmem>>, vector<32x96xbf16>
      tpu.vector_store %arg6[%c0_14, %c0_15], %16 {strides = array<i32>} : memref<32x96xbf16, #tpu.memory_space<vmem>>, vector<32x96xbf16>,
    } else {
    }
    return
  }
  func.func @transform_0(%arg0: i32, %arg1: i32, %arg2: i32) -> (i32, i32) {
    %c0_i32 = arith.constant 0 : i32
    return %arg0, %arg2 : i32, i32
  }
  func.func @transform_1(%arg0: i32, %arg1: i32, %arg2: i32) -> (i32, i32) {
    %c0_i32 = arith.constant 0 : i32
    return %arg1, %arg2 : i32, i32
  }
  func.func @transform_2(%arg0: i32, %arg1: i32, %arg2: i32) -> (i32, i32) {
    %c0_i32 = arith.constant 0 : i32
    %c0_i32_0 = arith.constant 0 : i32
    return %c0_i32, %arg1 : i32, i32
  }
  func.func @transform_3(%arg0: i32, %arg1: i32, %arg2: i32) -> (i32, i32) {
    %c0_i32 = arith.constant 0 : i32
    return %arg0, %arg1 : i32, i32
  }
}

module attributes {stable_mosaic.version = 11 : i64} {
  func.func @_ring_attn_kernel(%arg0: i32, %arg1: i32, %arg2: i32, %arg3: i32, %arg4: memref<16x1x4x8xbf16, #tpu.memory_space<vmem>>, %arg5: memref<8x1x4x8xbf16, #tpu.memory_space<vmem>>, %arg6: memref<8x1x4x8xbf16, #tpu.memory_space<vmem>>, %arg7: memref<16x4x8xbf16, #tpu.memory_space<vmem>>, %arg8: memref<4x16x8xbf16, #tpu.memory_space<vmem>>, %arg9: memref<4x16x1xf32, #tpu.memory_space<vmem>>, %arg10: memref<4x16x1xf32, #tpu.memory_space<vmem>>, %arg11: memref<4x16x8xf32, #tpu.memory_space<vmem>>, %arg12: memref<4x16x8xf32, #tpu.memory_space<vmem>>) attributes {dimension_semantics = [#tpu.dimension_semantics<parallel>, #tpu.dimension_semantics<parallel>, #tpu.dimension_semantics<arbitrary>, #tpu.dimension_semantics<arbitrary>], iteration_bounds = array<i64: 2, 1, 2, 1>, scalar_prefetch = 0 : i64, scratch_operands = 5 : i64, tpu.core_type = #tpu.core_type<tc>, window_params = [{transform_indices = @transform_0, window_bounds = array<i64: 16, 1, 4, 8>}, {transform_indices = @transform_1, window_bounds = array<i64: 8, 1, 4, 8>}, {transform_indices = @transform_2, window_bounds = array<i64: 8, 1, 4, 8>}, {transform_indices = @transform_3, window_bounds = array<i64: 16, 4, 8>}]} {
    %c0_i32 = arith.constant 0 : i32
    %0 = arith.cmpi eq, %arg2, %c0_i32 : i32
    %c0_i32_0 = arith.constant 0 : i32
    %1 = arith.cmpi eq, %arg3, %c0_i32_0 : i32
    %2 = arith.andi %0, %1 : i1
    %3 = arith.extui %2 : i1 to i32
    %c0_i32_1 = arith.constant 0 : i32
    %4 = arith.cmpi ne, %3, %c0_i32_1 : i32
    scf.if %4 {
      %c0_39 = arith.constant 0 : index
      %c0_40 = arith.constant 0 : index
      %c0_41 = arith.constant 0 : index
      %c0_42 = arith.constant 0 : index
      %47 = vector.load %arg4[%c0_39, %c0_40, %c0_41, %c0_42] : memref<16x1x4x8xbf16, #tpu.memory_space<vmem>>, vector<16x1x4x8xbf16>
      %48 = vector.shape_cast %47 : vector<16x1x4x8xbf16> to vector<16x4x8xbf16>
      %49 = tpu.transpose %48, [1, 0, 2] : vector<16x4x8xbf16> -> vector<4x16x8xbf16>
      %cst_43 = arith.constant 3.535160e-01 : bf16
      %50 = vector.broadcast %cst_43 : bf16 to vector<4x16x8xbf16>
      %51 = arith.mulf %49, %50 : vector<4x16x8xbf16>
      %c0_44 = arith.constant 0 : index
      %c0_45 = arith.constant 0 : index
      %c0_46 = arith.constant 0 : index
      %52 = vector.load %arg8[%c0_44, %c0_45, %c0_46] : memref<4x16x8xbf16, #tpu.memory_space<vmem>>, vector<4x16x8xbf16>
      tpu.vector_store %arg8[%c0_44, %c0_45, %c0_46], %51 {strides = array<i32>} : memref<4x16x8xbf16, #tpu.memory_space<vmem>>, vector<4x16x8xbf16>,
      %cst_47 = arith.constant 0.000000e+00 : f32
      %53 = vector.broadcast %cst_47 : f32 to vector<4x16x8xf32>
      %c0_48 = arith.constant 0 : index
      %c0_49 = arith.constant 0 : index
      %c0_50 = arith.constant 0 : index
      %54 = vector.load %arg12[%c0_48, %c0_49, %c0_50] : memref<4x16x8xf32, #tpu.memory_space<vmem>>, vector<4x16x8xf32>
      tpu.vector_store %arg12[%c0_48, %c0_49, %c0_50], %53 {strides = array<i32>} : memref<4x16x8xf32, #tpu.memory_space<vmem>>, vector<4x16x8xf32>,
    } else {
    }
    %c0_i32_2 = arith.constant 0 : i32
    %5 = arith.cmpi eq, %arg3, %c0_i32_2 : i32
    %6 = arith.extui %5 : i1 to i32
    %c0_i32_3 = arith.constant 0 : i32
    %7 = arith.cmpi ne, %6, %c0_i32_3 : i32
    scf.if %7 {
      %cst_39 = arith.constant 0xFF800000 : f32
      %47 = vector.broadcast %cst_39 : f32 to vector<4x16x1xf32>
      %c0_40 = arith.constant 0 : index
      %c0_41 = arith.constant 0 : index
      %c0_42 = arith.constant 0 : index
      %48 = vector.load %arg9[%c0_40, %c0_41, %c0_42] : memref<4x16x1xf32, #tpu.memory_space<vmem>>, vector<4x16x1xf32>
      tpu.vector_store %arg9[%c0_40, %c0_41, %c0_42], %47 {strides = array<i32>} : memref<4x16x1xf32, #tpu.memory_space<vmem>>, vector<4x16x1xf32>,
      %cst_43 = arith.constant 0.000000e+00 : f32
      %49 = vector.broadcast %cst_43 : f32 to vector<4x16x1xf32>
      %c0_44 = arith.constant 0 : index
      %c0_45 = arith.constant 0 : index
      %c0_46 = arith.constant 0 : index
      %50 = vector.load %arg10[%c0_44, %c0_45, %c0_46] : memref<4x16x1xf32, #tpu.memory_space<vmem>>, vector<4x16x1xf32>
      tpu.vector_store %arg10[%c0_44, %c0_45, %c0_46], %49 {strides = array<i32>} : memref<4x16x1xf32, #tpu.memory_space<vmem>>, vector<4x16x1xf32>,
      %cst_47 = arith.constant 0.000000e+00 : f32
      %51 = vector.broadcast %cst_47 : f32 to vector<4x16x8xf32>
      %c0_48 = arith.constant 0 : index
      %c0_49 = arith.constant 0 : index
      %c0_50 = arith.constant 0 : index
      %52 = vector.load %arg11[%c0_48, %c0_49, %c0_50] : memref<4x16x8xf32, #tpu.memory_space<vmem>>, vector<4x16x8xf32>
      tpu.vector_store %arg11[%c0_48, %c0_49, %c0_50], %51 {strides = array<i32>} : memref<4x16x8xf32, #tpu.memory_space<vmem>>, vector<4x16x8xf32>,
    } else {
    }
    %c0 = arith.constant 0 : index
    %c0_4 = arith.constant 0 : index
    %c0_5 = arith.constant 0 : index
    %8 = vector.load %arg8[%c0, %c0_4, %c0_5] : memref<4x16x8xbf16, #tpu.memory_space<vmem>>, vector<4x16x8xbf16>
    %c0_6 = arith.constant 0 : index
    %c0_7 = arith.constant 0 : index
    %c0_8 = arith.constant 0 : index
    %c0_9 = arith.constant 0 : index
    %9 = vector.load %arg5[%c0_6, %c0_7, %c0_8, %c0_9] : memref<8x1x4x8xbf16, #tpu.memory_space<vmem>>, vector<8x1x4x8xbf16>
    %10 = vector.shape_cast %9 : vector<8x1x4x8xbf16> to vector<8x4x8xbf16>
    %11 = tpu.transpose %10, [1, 0, 2] : vector<8x4x8xbf16> -> vector<4x8x8xbf16>
    %c0_10 = arith.constant 0 : index
    %c0_11 = arith.constant 0 : index
    %c0_12 = arith.constant 0 : index
    %c0_13 = arith.constant 0 : index
    %12 = vector.load %arg6[%c0_10, %c0_11, %c0_12, %c0_13] : memref<8x1x4x8xbf16, #tpu.memory_space<vmem>>, vector<8x1x4x8xbf16>
    %13 = vector.shape_cast %12 : vector<8x1x4x8xbf16> to vector<8x4x8xbf16>
    %14 = tpu.transpose %13, [1, 0, 2] : vector<8x4x8xbf16> -> vector<4x8x8xbf16>
    "tpu.trace_start"() <{level = 10 : i32, message = "hqd,hkd->hqk"}> : () -> ()
    %cst = arith.constant dense<0.000000e+00> : vector<4x16x8xf32>
    %15 = tpu.matmul %8, %11, %cst {dimension_numbers = #tpu.dot_dimension_numbers<[2], [2], [1], [1], [0, 0, 0, 1, 1, 1], [0], [0]>} : vector<4x16x8xbf16>, vector<4x8x8xbf16>, vector<4x16x8xf32> -> vector<4x16x8xf32>
    "tpu.trace_stop"() : () -> ()
    %c0_14 = arith.constant 0 : index
    %c0_15 = arith.constant 0 : index
    %c0_16 = arith.constant 0 : index
    %16 = vector.load %arg9[%c0_14, %c0_15, %c0_16] : memref<4x16x1xf32, #tpu.memory_space<vmem>>, vector<4x16x1xf32>
    %cst_17 = arith.constant dense<0xFF800000> : vector<4x16xf32>
    %17 = vector.multi_reduction <maximumf>, %15, %cst_17 [2] : vector<4x16x8xf32> to vector<4x16xf32>
    %18 = vector.shape_cast %17 : vector<4x16xf32> to vector<4x16x1xf32>
    %19 = arith.maximumf %16, %18 : vector<4x16x1xf32>
    %20 = arith.subf %16, %19 : vector<4x16x1xf32>
    %21 = math.exp %20 : vector<4x16x1xf32>
    %22 = vector.broadcast %19 : vector<4x16x1xf32> to vector<4x16x8xf32>
    %23 = arith.subf %15, %22 : vector<4x16x8xf32>
    %24 = math.exp %23 : vector<4x16x8xf32>
    %c0_18 = arith.constant 0 : index
    %c0_19 = arith.constant 0 : index
    %c0_20 = arith.constant 0 : index
    %25 = vector.load %arg10[%c0_18, %c0_19, %c0_20] : memref<4x16x1xf32, #tpu.memory_space<vmem>>, vector<4x16x1xf32>
    %26 = arith.mulf %21, %25 : vector<4x16x1xf32>
    %cst_21 = arith.constant dense<0.000000e+00> : vector<4x16xf32>
    %27 = vector.multi_reduction <add>, %24, %cst_21 [2] : vector<4x16x8xf32> to vector<4x16xf32>
    %28 = vector.shape_cast %27 : vector<4x16xf32> to vector<4x16x1xf32>
    %29 = arith.addf %26, %28 : vector<4x16x1xf32>
    %c0_22 = arith.constant 0 : index
    %c0_23 = arith.constant 0 : index
    %c0_24 = arith.constant 0 : index
    %30 = vector.load %arg10[%c0_22, %c0_23, %c0_24] : memref<4x16x1xf32, #tpu.memory_space<vmem>>, vector<4x16x1xf32>
    tpu.vector_store %arg10[%c0_22, %c0_23, %c0_24], %29 {strides = array<i32>} : memref<4x16x1xf32, #tpu.memory_space<vmem>>, vector<4x16x1xf32>,
    %c0_25 = arith.constant 0 : index
    %c0_26 = arith.constant 0 : index
    %c0_27 = arith.constant 0 : index
    %31 = vector.load %arg11[%c0_25, %c0_26, %c0_27] : memref<4x16x8xf32, #tpu.memory_space<vmem>>, vector<4x16x8xf32>
    %32 = vector.broadcast %21 : vector<4x16x1xf32> to vector<4x16x8xf32>
    %33 = arith.mulf %32, %31 : vector<4x16x8xf32>
    %34 = arith.truncf %24 : vector<4x16x8xf32> to vector<4x16x8xbf16>
    "tpu.trace_start"() <{level = 10 : i32, message = "hqk,hkd->hqd"}> : () -> ()
    %cst_28 = arith.constant dense<0.000000e+00> : vector<4x16x8xf32>
    %35 = tpu.matmul %34, %14, %cst_28 {dimension_numbers = #tpu.dot_dimension_numbers<[2], [1], [1], [2], [0, 0, 0, 1, 1, 2], [0], [0]>} : vector<4x16x8xbf16>, vector<4x8x8xbf16>, vector<4x16x8xf32> -> vector<4x16x8xf32>
    "tpu.trace_stop"() : () -> ()
    %36 = arith.addf %33, %35 : vector<4x16x8xf32>
    %c0_29 = arith.constant 0 : index
    %c0_30 = arith.constant 0 : index
    %c0_31 = arith.constant 0 : index
    %37 = vector.load %arg11[%c0_29, %c0_30, %c0_31] : memref<4x16x8xf32, #tpu.memory_space<vmem>>, vector<4x16x8xf32>
    tpu.vector_store %arg11[%c0_29, %c0_30, %c0_31], %36 {strides = array<i32>} : memref<4x16x8xf32, #tpu.memory_space<vmem>>, vector<4x16x8xf32>,
    %c0_32 = arith.constant 0 : index
    %c0_33 = arith.constant 0 : index
    %c0_34 = arith.constant 0 : index
    %38 = vector.load %arg9[%c0_32, %c0_33, %c0_34] : memref<4x16x1xf32, #tpu.memory_space<vmem>>, vector<4x16x1xf32>
    tpu.vector_store %arg9[%c0_32, %c0_33, %c0_34], %19 {strides = array<i32>} : memref<4x16x1xf32, #tpu.memory_space<vmem>>, vector<4x16x1xf32>,
    %c0_i32_35 = arith.constant 0 : i32
    %39 = arith.cmpi eq, %arg3, %c0_i32_35 : i32
    %40 = arith.extui %39 : i1 to i32
    %c0_i32_36 = arith.constant 0 : i32
    %41 = arith.cmpi ne, %40, %c0_i32_36 : i32
    scf.if %41 {
      %c0_39 = arith.constant 0 : index
      %c0_40 = arith.constant 0 : index
      %c0_41 = arith.constant 0 : index
      %47 = vector.load %arg12[%c0_39, %c0_40, %c0_41] : memref<4x16x8xf32, #tpu.memory_space<vmem>>, vector<4x16x8xf32>
      %c0_42 = arith.constant 0 : index
      %c0_43 = arith.constant 0 : index
      %c0_44 = arith.constant 0 : index
      %48 = vector.load %arg11[%c0_42, %c0_43, %c0_44] : memref<4x16x8xf32, #tpu.memory_space<vmem>>, vector<4x16x8xf32>
      %c0_45 = arith.constant 0 : index
      %c0_46 = arith.constant 0 : index
      %c0_47 = arith.constant 0 : index
      %49 = vector.load %arg10[%c0_45, %c0_46, %c0_47] : memref<4x16x1xf32, #tpu.memory_space<vmem>>, vector<4x16x1xf32>
      %50 = tpu.reciprocal %49 {approx = true} : vector<4x16x1xf32> -> vector<4x16x1xf32>
      %51 = vector.broadcast %50 : vector<4x16x1xf32> to vector<4x16x8xf32>
      %52 = arith.mulf %48, %51 : vector<4x16x8xf32>
      %53 = arith.addf %47, %52 : vector<4x16x8xf32>
      %c0_48 = arith.constant 0 : index
      %c0_49 = arith.constant 0 : index
      %c0_50 = arith.constant 0 : index
      %54 = vector.load %arg12[%c0_48, %c0_49, %c0_50] : memref<4x16x8xf32, #tpu.memory_space<vmem>>, vector<4x16x8xf32>
      tpu.vector_store %arg12[%c0_48, %c0_49, %c0_50], %53 {strides = array<i32>} : memref<4x16x8xf32, #tpu.memory_space<vmem>>, vector<4x16x8xf32>,
    } else {
    }
    %c1_i32 = arith.constant 1 : i32
    %42 = arith.cmpi eq, %arg2, %c1_i32 : i32
    %c0_i32_37 = arith.constant 0 : i32
    %43 = arith.cmpi eq, %arg3, %c0_i32_37 : i32
    %44 = arith.andi %42, %43 : i1
    %45 = arith.extui %44 : i1 to i32
    %c0_i32_38 = arith.constant 0 : i32
    %46 = arith.cmpi ne, %45, %c0_i32_38 : i32
    scf.if %46 {
      %c0_39 = arith.constant 0 : index
      %c0_40 = arith.constant 0 : index
      %c0_41 = arith.constant 0 : index
      %47 = vector.load %arg12[%c0_39, %c0_40, %c0_41] : memref<4x16x8xf32, #tpu.memory_space<vmem>>, vector<4x16x8xf32>
      %48 = tpu.transpose %47, [1, 0, 2] : vector<4x16x8xf32> -> vector<16x4x8xf32>
      %49 = arith.truncf %48 : vector<16x4x8xf32> to vector<16x4x8xbf16>
      %c0_42 = arith.constant 0 : index
      %c0_43 = arith.constant 0 : index
      %c0_44 = arith.constant 0 : index
      %50 = vector.load %arg7[%c0_42, %c0_43, %c0_44] : memref<16x4x8xbf16, #tpu.memory_space<vmem>>, vector<16x4x8xbf16>
      tpu.vector_store %arg7[%c0_42, %c0_43, %c0_44], %49 {strides = array<i32>} : memref<16x4x8xbf16, #tpu.memory_space<vmem>>, vector<16x4x8xbf16>,
    } else {
    }
    return
  }
  func.func @transform_0(%arg0: i32, %arg1: i32, %arg2: i32, %arg3: i32) -> (i32, i32, i32, i32) {
    %c1_i32 = arith.constant 1 : i32
    %0 = arith.muli %arg0, %c1_i32 : i32
    %1 = arith.addi %0, %arg1 : i32
    %c0_i32 = arith.constant 0 : i32
    %c0_i32_0 = arith.constant 0 : i32
    %c0_i32_1 = arith.constant 0 : i32
    %c0_i32_2 = arith.constant 0 : i32
    return %1, %c0_i32, %c0_i32_0, %c0_i32_1 : i32, i32, i32, i32
  }
  func.func @transform_1(%arg0: i32, %arg1: i32, %arg2: i32, %arg3: i32) -> (i32, i32, i32, i32) {
    %c2_i32 = arith.constant 2 : i32
    %0 = arith.muli %arg0, %c2_i32 : i32
    %c1_i32 = arith.constant 1 : i32
    %1 = arith.muli %arg2, %c1_i32 : i32
    %2 = arith.addi %0, %1 : i32
    %3 = arith.addi %2, %arg3 : i32
    %c1_i32_0 = arith.constant 1 : i32
    %c0_i32 = arith.constant 0 : i32
    %c0_i32_1 = arith.constant 0 : i32
    %c0_i32_2 = arith.constant 0 : i32
    return %3, %c1_i32_0, %c0_i32, %c0_i32_1 : i32, i32, i32, i32
  }
  func.func @transform_2(%arg0: i32, %arg1: i32, %arg2: i32, %arg3: i32) -> (i32, i32, i32, i32) {
    %c2_i32 = arith.constant 2 : i32
    %0 = arith.muli %arg0, %c2_i32 : i32
    %c1_i32 = arith.constant 1 : i32
    %1 = arith.muli %arg2, %c1_i32 : i32
    %2 = arith.addi %0, %1 : i32
    %3 = arith.addi %2, %arg3 : i32
    %c2_i32_0 = arith.constant 2 : i32
    %c0_i32 = arith.constant 0 : i32
    %c0_i32_1 = arith.constant 0 : i32
    %c0_i32_2 = arith.constant 0 : i32
    return %3, %c2_i32_0, %c0_i32, %c0_i32_1 : i32, i32, i32, i32
  }
  func.func @transform_3(%arg0: i32, %arg1: i32, %arg2: i32, %arg3: i32) -> (i32, i32, i32) {
    %c1_i32 = arith.constant 1 : i32
    %0 = arith.muli %arg0, %c1_i32 : i32
    %1 = arith.addi %0, %arg1 : i32
    %c0_i32 = arith.constant 0 : i32
    %c0_i32_0 = arith.constant 0 : i32
    %c0_i32_1 = arith.constant 0 : i32
    return %1, %c0_i32, %c0_i32_0 : i32, i32, i32
  }
}

module attributes {stable_mosaic.version = 11 : i64} {
  func.func @_linear_kernel(%arg0: i32, %arg1: i32, %arg2: i32, %arg3: memref<32x32xbf16, #tpu.memory_space<vmem>>, %arg4: memref<32x32xbf16, #tpu.memory_space<vmem>>, %arg5: memref<1x32xf32, #tpu.memory_space<vmem>>, %arg6: memref<32x32xf32, #tpu.memory_space<vmem>>, %arg7: memref<32x32xf32, #tpu.memory_space<vmem>>) attributes {dimension_semantics = [#tpu.dimension_semantics<parallel>, #tpu.dimension_semantics<parallel>, #tpu.dimension_semantics<arbitrary>], iteration_bounds = array<i64: 1, 1, 1>, scalar_prefetch = 0 : i64, scratch_operands = 1 : i64, tpu.core_type = #tpu.core_type<tc>, window_params = [{transform_indices = @transform_0, window_bounds = array<i64: 32, 32>}, {transform_indices = @transform_1, window_bounds = array<i64: 32, 32>}, {transform_indices = @transform_2, window_bounds = array<i64: 1, 32>}, {transform_indices = @transform_3, window_bounds = array<i64: 32, 32>}]} {
    %c0_i32 = arith.constant 0 : i32
    %0 = arith.cmpi eq, %arg2, %c0_i32 : i32
    %1 = arith.extui %0 : i1 to i32
    %c0_i32_0 = arith.constant 0 : i32
    %2 = arith.cmpi ne, %1, %c0_i32_0 : i32
    scf.if %2 {
      %cst_10 = arith.constant 0.000000e+00 : f32
      %12 = vector.broadcast %cst_10 : f32 to vector<32x32xf32>
      %c0_11 = arith.constant 0 : index
      %c0_12 = arith.constant 0 : index
      %13 = vector.load %arg7[%c0_11, %c0_12] : memref<32x32xf32, #tpu.memory_space<vmem>>, vector<32x32xf32>
      tpu.vector_store %arg7[%c0_11, %c0_12], %12 {strides = array<i32>} : memref<32x32xf32, #tpu.memory_space<vmem>>, vector<32x32xf32>,
    } else {
    }
    %c0 = arith.constant 0 : index
    %c0_1 = arith.constant 0 : index
    %3 = vector.load %arg7[%c0, %c0_1] : memref<32x32xf32, #tpu.memory_space<vmem>>, vector<32x32xf32>
    %c0_2 = arith.constant 0 : index
    %c0_3 = arith.constant 0 : index
    %4 = vector.load %arg3[%c0_2, %c0_3] : memref<32x32xbf16, #tpu.memory_space<vmem>>, vector<32x32xbf16>
    %c0_4 = arith.constant 0 : index
    %c0_5 = arith.constant 0 : index
    %5 = vector.load %arg4[%c0_4, %c0_5] : memref<32x32xbf16, #tpu.memory_space<vmem>>, vector<32x32xbf16>
    %cst = arith.constant dense<0.000000e+00> : vector<32x32xf32>
    %6 = tpu.matmul %4, %5, %cst {dimension_numbers = #tpu.dot_dimension_numbers<[1], [1], [0], [0], [0, 0, 1, 0], [], []>} : vector<32x32xbf16>, vector<32x32xbf16>, vector<32x32xf32> -> vector<32x32xf32>
    %7 = arith.addf %3, %6 : vector<32x32xf32>
    %c0_6 = arith.constant 0 : index
    %c0_7 = arith.constant 0 : index
    %8 = vector.load %arg7[%c0_6, %c0_7] : memref<32x32xf32, #tpu.memory_space<vmem>>, vector<32x32xf32>
    tpu.vector_store %arg7[%c0_6, %c0_7], %7 {strides = array<i32>} : memref<32x32xf32, #tpu.memory_space<vmem>>, vector<32x32xf32>,
    %c0_i32_8 = arith.constant 0 : i32
    %9 = arith.cmpi eq, %arg2, %c0_i32_8 : i32
    %10 = arith.extui %9 : i1 to i32
    %c0_i32_9 = arith.constant 0 : i32
    %11 = arith.cmpi ne, %10, %c0_i32_9 : i32
    scf.if %11 {
      %c0_10 = arith.constant 0 : index
      %c0_11 = arith.constant 0 : index
      %12 = vector.load %arg7[%c0_10, %c0_11] : memref<32x32xf32, #tpu.memory_space<vmem>>, vector<32x32xf32>
      %c0_12 = arith.constant 0 : index
      %c0_13 = arith.constant 0 : index
      %13 = vector.load %arg5[%c0_12, %c0_13] : memref<1x32xf32, #tpu.memory_space<vmem>>, vector<1x32xf32>
      %14 = vector.broadcast %13 : vector<1x32xf32> to vector<32x32xf32>
      %15 = arith.addf %12, %14 : vector<32x32xf32>
      %c0_14 = arith.constant 0 : index
      %c0_15 = arith.constant 0 : index
      %16 = vector.load %arg6[%c0_14, %c0_15] : memref<32x32xf32, #tpu.memory_space<vmem>>, vector<32x32xf32>
      tpu.vector_store %arg6[%c0_14, %c0_15], %15 {strides = array<i32>} : memref<32x32xf32, #tpu.memory_space<vmem>>, vector<32x32xf32>,
    } else {
    }
    return
  }
  func.func @transform_0(%arg0: i32, %arg1: i32, %arg2: i32) -> (i32, i32) {
    %c0_i32 = arith.constant 0 : i32
    return %arg0, %arg2 : i32, i32
  }
  func.func @transform_1(%arg0: i32, %arg1: i32, %arg2: i32) -> (i32, i32) {
    %c0_i32 = arith.constant 0 : i32
    return %arg1, %arg2 : i32, i32
  }
  func.func @transform_2(%arg0: i32, %arg1: i32, %arg2: i32) -> (i32, i32) {
    %c0_i32 = arith.constant 0 : i32
    %c0_i32_0 = arith.constant 0 : i32
    return %c0_i32, %arg1 : i32, i32
  }
  func.func @transform_3(%arg0: i32, %arg1: i32, %arg2: i32) -> (i32, i32) {
    %c0_i32 = arith.constant 0 : i32
    return %arg0, %arg1 : i32, i32
  }
}

</mosaic_0001>

<bundles_post_ra>
// kernel: ring_self_attention_forward.3
= control target key start
LH: loop header
LB: loop body
LE: loop exit
PB: predicated region body
PF: predicated region fallthrough
CT: control target
= control target key end

     0   :  { %vm84_vm0 = vcmask 261120   ;;  %vm19_vm1 = vcmask 785408   ;;  %v268_v1 = vmov 0.0   ;;  %vm201_vm2 = vcmask 781312   ;;  %s350_s1 = inlined_call_operand.vmem [shape: bf16[96,32], index: 1, kind: input, shape index: {}]   ;;  %s351_s0 = inlined_call_operand.vmem [shape: bf16[32,32], index: 0, kind: input, shape index: {}]   ;;  %s352_s2 = inlined_call_operand.vmem [shape: f32[1,96], index: 2, kind: input, shape index: {}]   ;;  %s353_s3 = inlined_call_operand.vmem [shape: bf16[32,96], index: 3, kind: output, shape index: {}]  }
   0x1   :  { %v260_v0 = vld [vmem:[%s350_s1 + $0x28] sm:$0xff]   ;;  %22 = vst.msk [vmem:[#allocation2 + $0x10] sm:$0xff] %vm19_vm1, %v268_v1  ;;  %20 = vst.msk [vmem:[#allocation2] sm:$0xff] %vm19_vm1, %v268_v1  ;;  %v261_v2 = vld [vmem:[%s350_s1 + $0x20] sm:$0xff]  }
   0x2   :  { %21 = vst.msk [vmem:[#allocation2 + $0x8] sm:$0xff] %vm19_vm1, %v268_v1  ;;  %23 = vst.msk [vmem:[#allocation2 + $0x18] sm:$0xff] %vm19_vm1, %v268_v1  ;;  %253 = vmatprep.subr.msk.bf16.mxu0 %vm84_vm0, %v260_v0  ;;  %v107_v3 = vsel %vm84_vm0, %v260_v0, 0  ;;  %v266_v4 = vld [vmem:[%s351_s0] sm:$0xff]   ;;  %v104_v5 = vsel %vm84_vm0, %v261_v2, 0  ;;  %v262_v6 = vld [vmem:[%s350_s1 + $0x18] sm:$0xff]  }
   0x3   :  { %238 = vmatpush3.bf16.xpose.msra.mxu0 %v107_v3  ;;  %249 = vmatprep.mubr.msk.bf16.mxu0 %vm84_vm0, %v266_v4  ;;  %v101_v7 = vsel %vm84_vm0, %v262_v6, 0  ;;  %v263_v8 = vld [vmem:[%s350_s1 + $0x10] sm:$0xff]   ;;  %v264_v10 = vld [vmem:[%s350_s1 + $0x8] sm:$0xff]   ;;  %v265_v12 = vld [vmem:[%s350_s1] sm:$0xff]  }
   0x4   :  { %254 = vmatprep.subr.msk.bf16.mxu0 %vm84_vm0, %v261_v2  ;;  %v98_v9 = vsel %vm84_vm0, %v263_v8, 0  ;;  %v95_v11 = vsel %vm84_vm0, %v264_v10, 0  ;;  %v92_v13 = vsel %vm84_vm0, %v265_v12, 0  ;;  %v267_v14 = vld [vmem:[%s351_s0 + $0x8] sm:$0xff]   ;;  %v220_v27 = vld [vmem:[%s352_s2] ss:$0 sm:$0xff] }
   0x8   :  { %v26_v15 = vld [vmem:[#allocation2 + $0x10] sm:$0xff]  ;;  %v24_v17 = vld [vmem:[#allocation2] sm:$0xff] }
   0x9   :  { %v27_v20 = vld [vmem:[#allocation2 + $0x18] sm:$0xff]  ;;  %v25_v23 = vld [vmem:[#allocation2 + $0x8] sm:$0xff] }
   0xb   :  { %240 = vmatpush3.bf16.xpose.msra.mxu0 %v104_v5 }
   0xc   :  { %255 = vmatprep.subr.msk.bf16.mxu0 %vm84_vm0, %v262_v6 }
  0x13   :  { %242 = vmatpush3.bf16.xpose.msra.mxu0 %v101_v7 }
  0x14   :  { %256 = vmatprep.subr.msk.bf16.mxu0 %vm84_vm0, %v263_v8 }
  0x1b   :  { %244 = vmatpush3.bf16.xpose.msra.mxu0 %v98_v9 }
  0x1c   :  { %257 = vmatprep.subr.msk.bf16.mxu0 %vm84_vm0, %v264_v10 }
  0x23   :  { %246 = vmatpush3.bf16.xpose.msra.mxu0 %v95_v11 }
  0x24   :  { %258 = vmatprep.subr.msk.bf16.mxu0 %vm84_vm0, %v265_v12 }
  0x2b   :  { %248 = vmatpush3.bf16.xpose.msra.mxu0 %v92_v13 }
  0x32   :  { %250 = vmatmul.mubr.msk.bf16.vlgmr.msra.gmra.mxu0 %vm84_vm0, %v267_v14 }
  0xf2   :  { %v251_v16 = vpop.f32.mrf.mxu0 }
  0xf3   :  { %v160_v18 = vadd.f32 %v251_v16, %v26_v15 }
  0xf4   :  { %v143_v19 = vpop.f32.mrf.mxu0 }
  0xf5   :  { %165 = vst.msk [vmem:[#allocation2 + $0x10] sm:$0xff] %vm19_vm1, %v160_v18  ;;  %v158_v21 = vadd.f32 %v143_v19, %v24_v17 }
  0xf6   :  { %v252_v22 = vpop.f32.mrf.mxu0 }
  0xf7   :  { %163 = vst.msk [vmem:[#allocation2] sm:$0xff] %vm19_vm1, %v158_v21  ;;  %v161_v24 = vadd.f32 %v252_v22, %v27_v20 }
  0xf8   :  { %v146_v25 = vpop.f32.mrf.mxu0 }
  0xf9   :  { %166 = vst.msk [vmem:[#allocation2 + $0x18] sm:$0xff] %vm19_vm1, %v161_v24  ;;  %v159_v26 = vadd.f32 %v146_v25, %v25_v23 }
  0xfb   :  { %164 = vst.msk [vmem:[#allocation2 + $0x8] sm:$0xff] %vm19_vm1, %v159_v26 }
  0xfc   :  { %v172_v28 = vld [vmem:[#allocation2 + $0x10] sm:$0xff] }
  0xfd   :  { %v183_v29 = vadd.f32 %v220_v27, %v172_v28 }
  0xfe   :  { %v170_v30 = vld [vmem:[#allocation2] sm:$0xff] }
  0xff   :  { %v227_v31 = vpack.c.bf16 %v183_v29, %v183_v29  ;;  %v181_v32 = vadd.f32 %v220_v27, %v170_v30 }
 0x100   :  { %v173_v33 = vld [vmem:[#allocation2 + $0x18] sm:$0xff] }
 0x101   :  { %204 = vst.msk [vmem:[%s353_s3 + $0x8] sm:$0xf] %vm201_vm2, %v227_v31  ;;  %v225_v34 = vpack.c.bf16 %v181_v32, %v181_v32  ;;  %v184_v35 = vadd.f32 %v220_v27, %v173_v33 }
 0x102   :  { %v171_v36 = vld [vmem:[#allocation2 + $0x8] sm:$0xff] }
 0x103   :  { %202 = vst.msk [vmem:[%s353_s3] sm:$0xf] %vm201_vm2, %v225_v34  ;;  %v228_v37 = vpack.c.bf16 %v184_v35, %v184_v35  ;;  %v182_v38 = vadd.f32 %v220_v27, %v171_v36 }
 0x105   :  { %205 = vst.msk [vmem:[%s353_s3 + $0xc] sm:$0xf] %vm201_vm2, %v228_v37  ;;  %v226_v39 = vpack.c.bf16 %v182_v38, %v182_v38 }
 0x107   :  { %203 = vst.msk [vmem:[%s353_s3 + $0x4] sm:$0xf] %vm201_vm2, %v226_v39 }

// kernel: ring_self_attention_forward.5
= control target key start
LH: loop header
LB: loop body
LE: loop exit
PB: predicated region body
PF: predicated region fallthrough
CT: control target
= control target key end

     0   :  { %vm20_vm0 = vcmask 261120   ;;  %v216_v4 = vmov 0.0   ;;  %s276_s0 = inlined_call_operand.vmem [shape: bf16[32,32], index: 0, kind: input, shape index: {}]   ;;  %s277_s1 = inlined_call_operand.vmem [shape: bf16[32,32], index: 1, kind: input, shape index: {}]   ;;  %s278_s2 = inlined_call_operand.vmem [shape: f32[1,32], index: 2, kind: input, shape index: {}]   ;;  %s279_s3 = inlined_call_operand.hbm [shape: f32[32,32], index: 3, kind: output, shape index: {}]  }
   0x1   :  { %v190_v0 = vld [vmem:[%s277_s1 + $0x8] sm:$0xff]   ;;  %v191_v1 = vld [vmem:[%s277_s1] sm:$0xff]   ;;  %23 = vst.msk [vmem:[#allocation2 + $0x10] sm:$0xff] %vm20_vm0, %v216_v4  ;;  %21 = vst.msk [vmem:[#allocation2] sm:$0xff] %vm20_vm0, %v216_v4 }
   0x2   :  { %184 = vmatprep.subr.msk.bf16.mxu0 %vm20_vm0, %v190_v0  ;;  %v68_v2 = vsel %vm20_vm0, %v190_v0, 0  ;;  %v192_v3 = vld [vmem:[%s276_s0] sm:$0xff]   ;;  %22 = vst.msk [vmem:[#allocation2 + $0x8] sm:$0xff] %vm20_vm0, %v216_v4  ;;  %24 = vst.msk [vmem:[#allocation2 + $0x18] sm:$0xff] %vm20_vm0, %v216_v4 }
   0x3   :  { %177 = vmatpush3.bf16.xpose.msra.mxu0 %v68_v2  ;;  %180 = vmatprep.mubr.msk.bf16.mxu0 %vm20_vm0, %v192_v3 }
   0x4   :  { %185 = vmatprep.subr.msk.bf16.mxu0 %vm20_vm0, %v191_v1 }
   0x5   :  { %8 = vsyncpa [#allocation4], 0  ;;  %v65_v5 = vsel %vm20_vm0, %v191_v1, 0  ;;  %v193_v6 = vld [vmem:[%s276_s0 + $0x8] sm:$0xff]   ;;  %v171_v19 = vld [vmem:[%s278_s2] ss:$0 sm:$0xff] }
   0x6   :  { %s217_s20 = smov [#allocation3]  }
   0x7   :  { %s154_s21 = sshll.u32 %s217_s20, 4  ;;  %s155_s21 = int_to_ptr.vmem [resolvable:$true] %s154_s21 }
   0x8   :  { %v27_v7 = vld [vmem:[#allocation2 + $0x10] sm:$0xff]  ;;  %v25_v9 = vld [vmem:[#allocation2] sm:$0xff]  ;;  %s194_s2 = scalar_lea.vmem %s155_s21, 512  ;;  %p199_p1 = scmp.lt.s32.totalorder %s155_s21, %s155_s21 }
   0x9   :  { %v28_v12 = vld [vmem:[#allocation2 + $0x18] sm:$0xff]  ;;  %v26_v15 = vld [vmem:[#allocation2 + $0x8] sm:$0xff]  ;;  %p195_p0 = scmp.ne.s32.totalorder %s155_s21, %s194_s2  ;;  %p200_p2 = scmp.lt.s32.totalorder %s194_s2, %s194_s2 }
   0xb   :  { %179 = vmatpush3.bf16.xpose.msra.mxu0 %v65_v5  ;;  %p201_p3 = por %p200_p2, %p199_p1 }
   0xd   :  { %p202_p4 = pnand %p201_p3, %p195_p0 }
  0x12   :  { %181 = vmatmul.mubr.msk.bf16.vlgmr.msra.gmra.mxu0 %vm20_vm0, %v193_v6 }
  0xd2   :  { %v182_v8 = vpop.f32.mrf.mxu0 }
  0xd3   :  { %v121_v10 = vadd.f32 %v182_v8, %v27_v7 }
  0xd4   :  { %v104_v11 = vpop.f32.mrf.mxu0 }
  0xd5   :  { %125 = vst.msk [vmem:[#allocation2 + $0x10] sm:$0xff] %vm20_vm0, %v121_v10  ;;  %v119_v13 = vadd.f32 %v104_v11, %v25_v9 }
  0xd6   :  { %v183_v14 = vpop.f32.mrf.mxu0 }
  0xd7   :  { %123 = vst.msk [vmem:[#allocation2] sm:$0xff] %vm20_vm0, %v119_v13  ;;  %v122_v16 = vadd.f32 %v183_v14, %v28_v12 }
  0xd8   :  { %v107_v17 = vpop.f32.mrf.mxu0 }
  0xd9   :  { %126 = vst.msk [vmem:[#allocation2 + $0x18] sm:$0xff] %vm20_vm0, %v122_v16  ;;  %v120_v18 = vadd.f32 %v107_v17, %v26_v15 }
  0xdb   :  { %124 = vst.msk [vmem:[#allocation2 + $0x8] sm:$0xff] %vm20_vm0, %v120_v18 }
  0xdc   :  { %v132_v20 = vld [vmem:[#allocation2 + $0x10] sm:$0xff] }
  0xdd   :  { %v143_v21 = vadd.f32 %v171_v19, %v132_v20 }
  0xde   :  { %v130_v22 = vld [vmem:[#allocation2] sm:$0xff] }
  0xdf   :  { %v141_v23 = vadd.f32 %v171_v19, %v130_v22  ;;  %147 = vst.msk [vmem:[#allocation3 + $0x10] sm:$0xff] %vm20_vm0, %v143_v21 }
  0xe0   :  { %v133_v24 = vld [vmem:[#allocation2 + $0x18] sm:$0xff] }
  0xe1   :  { %v144_v25 = vadd.f32 %v171_v19, %v133_v24  ;;  %145 = vst.msk [vmem:[#allocation3] sm:$0xff] %vm20_vm0, %v141_v23 }
  0xe2   :  { %v131_v26 = vld [vmem:[#allocation2 + $0x8] sm:$0xff] }
  0xe3   :  { %v142_v27 = vadd.f32 %v171_v19, %v131_v26  ;;  %148 = vst.msk [vmem:[#allocation3 + $0x18] sm:$0xff] %vm20_vm0, %v144_v25 }
  0xe5   :  { %146 = vst.msk [vmem:[#allocation3 + $0x8] sm:$0xff] %vm20_vm0, %v142_v27 }
  0xe6   :  { %205 = shalt.err (!%p202_p4)
}
  0xe7   :  { %s218_s22 = smov 128   ;;  %s219_s23 = smov 8  }
  0xe8   :  { %160 = dma.vmem_to_hbm [thread:$0]  %s155_s21, 512, %s279_s3, [#allocation4], %s218_s22, %s218_s22, %s219_s23  }
  0xe9   :  { %214 = dma.done.wait [#allocation4], 512  }
  0xea   :  { %215 = vsyncadd [#allocation4], 4294966784 }
  0xeb   :  { %164 = vsyncpa [#allocation4], 1 }

// kernel: ring_self_attention_forward.4
= control target key start
LH: loop header
LB: loop body
LE: loop exit
PB: predicated region body
PF: predicated region fallthrough
CT: control target
= control target key end

     0   :  { %s2518_s12 = smov 0   ;;  %s2520_s13 = smov 0   ;;  %s3037_s0 = inlined_call_operand.vmem [shape: bf16[32,3,4,8], index: 0, kind: input, shape index: {}, may-alias: {0,1,2}]   ;;  %s3038_s1 = inlined_call_operand.vmem [shape: bf16[32,3,4,8], index: 1, kind: input, shape index: {}, may-alias: {0,1,2}]   ;;  %s3039_s2 = inlined_call_operand.vmem [shape: bf16[32,3,4,8], index: 2, kind: input, shape index: {}, may-alias: {0,1,2}]   ;;  %s3040_s3 = inlined_call_operand.vmem [shape: bf16[32,4,8], index: 3, kind: output, shape index: {}]  }
   0x1   :  { %s2522_s14 = smov 0   ;;  %s2524_s15 = smov 0  }
   0x2   :  { %s2526_s16 = smov 0   ;;  %s2528_s17 = smov 0  }
   0x3   :  { %s2530_s18 = smov 0   ;;  %s2532_s19 = smov 0  }
   0x4   :  { %s2534_s20 = smov 0  }
   0x5 LB: > { %s31_s21 = sadd.s32 1, %s2478_s18  ;;  %s39_s22 = sadd.s32 1, %s2482_s19  ;;  %s2486_s20 = sphi %s2534_s20, %s13_s20   ;;  %s2482_s19 = sphi %s2532_s19, %s3050_s19   ;;  %s2478_s18 = sphi %s2530_s18, %s3049_s18   ;;  %s2474_s17 = sphi %s2528_s17, %s3048_s17   ;;  %s2470_s16 = sphi %s2526_s16, %s3047_s16   ;;  %s2466_s15 = sphi %s2524_s15, %s3046_s15   ;;  %s2462_s14 = sphi %s2522_s14, %s3045_s14   ;;  %s2458_s13 = sphi %s2520_s13, %s3044_s13   ;;  %s2454_s12 = sphi %s2518_s12, %s3043_s12  }
   0x6   : > { %p33_p0 = scmp.ge.s32.totalorder %s31_s21, 2  ;;  %p55_p1 = scmp.ne.s32.totalorder %s2466_s15, %s2462_s14 }
   0x7   : > { %p56_p2 = scmp.eq.s32.totalorder %s2486_s20, 0  ;;  %s2126_s24 = sshll.u32 %s2482_s19, 1 }
   0x8   : > { %s3052_s21 = smov (%p33_p0, %s31_s21), 0  ;;  %s3054_s22 = smov (!%p33_p0, %s39_s22), %s2482_s19 }
   0x9   : > { %p2571_p3 = por %p56_p2, %p55_p1  ;;  %p41_p4 = scmp.ge.s32.totalorder %s3054_s22, 2 }
   0xa   : > { %s48_s25 = sadd.s32 1, %s2466_s15  ;;  %p87_p5 = scmp.ne.s32.totalorder %s2458_s13, %s2454_s12 }
   0xb   : > { %s3056_s22 = smov (%p41_p4, %s3054_s22), 0  ;;  %s2582_s26 = sadd.s32 %s2478_s18, %s2126_s24 }
   0xc   : > { %p2584_p6 = por %p87_p5, %p56_p2  ;;  %s45_s28 = ssub.s32 %s2482_s19, %s3056_s22 }
   0xd   : > { %s2127_s29 = sshll.u32 %s3056_s22, 1  ;;  %p46_p7 = scmp.eq.s32.totalorder %s45_s28, 0 }
   0xe   : > { %s75_s30 = sadd.s32 %s2127_s29, %s3052_s21  ;;  %s80_s5 = sadd.s32 1, %s2458_s13 }
   0xf   : > { %s77_s4 = ssub.s32 %s2582_s26, %s75_s30  ;;  %p2131_p9 = scmp.ge.s32.totalorder %s2486_s20, 4 }
  0x10   : > { %s2595_s6 = scalar_select %p46_p7, %s2466_s15, %s48_s25  }
  0x11   : > { %p78_p8 = scmp.eq.s32.totalorder %s77_s4, 0  ;;  %173 = sbr.rel (%p2131_p9) target bundleno = 57 (0x39), region = 16 }
  0x13   : > { %s2598_s7 = scalar_select %p78_p8, %s2458_s13, %s80_s5  }
  0x16   : > { %176 = sbr.rel (!%p2571_p3) target bundleno = 37 (0x25), region = 20  ;;  %s178_s8 = sand.u32 (%p2571_p3), 1, %s2466_s15  }
  0x17   : > { %s2246_s9 = smul.u32 (%p2571_p3), 96, %s2482_s19  ;;  %s2132_s10 = sshll.u32 (%p2571_p3), %s178_s8, 5 }
  0x18   : > { %s180_s23 = scalar_lea.vmem (%p2571_p3), [#allocation7], %s2132_s10 }
  0x19   : > { %s2608_s28 = scalar_lea.vmem (%p2571_p3), %s3037_s0, %s2246_s9 }
  0x1a   : > { %v202_v0 = vld [vmem:[%s2608_s28] sm:$0x3] (%p2571_p3)  ;;  %v204_v1 = vld [vmem:[%s2608_s28 + $0x6] sm:$0x3] (%p2571_p3)  ;;  %v206_v2 = vld [vmem:[%s2608_s28 + $0xc] sm:$0x3] (%p2571_p3) }
  0x1b   : > { %203 = vst [vmem:[%s180_s23] sm:$0x3] %v202_v0  ;;  %205 = vst [vmem:[%s180_s23 + $0x2] sm:$0x3] %v204_v1  ;;  %v208_v3 = vld [vmem:[%s2608_s28 + $0x12] sm:$0x3] }
  0x1c   : > { %207 = vst [vmem:[%s180_s23 + $0x4] sm:$0x3] %v206_v2  ;;  %v210_v4 = vld [vmem:[%s2608_s28 + $0x18] sm:$0x3]  ;;  %v212_v5 = vld [vmem:[%s2608_s28 + $0x1e] sm:$0x3] }
  0x1d   : > { %209 = vst [vmem:[%s180_s23 + $0x6] sm:$0x3] %v208_v3  ;;  %211 = vst [vmem:[%s180_s23 + $0x8] sm:$0x3] %v210_v4  ;;  %v214_v6 = vld [vmem:[%s2608_s28 + $0x24] sm:$0x3] }
  0x1e   : > { %213 = vst [vmem:[%s180_s23 + $0xa] sm:$0x3] %v212_v5  ;;  %v216_v7 = vld [vmem:[%s2608_s28 + $0x2a] sm:$0x3]  ;;  %v218_v8 = vld [vmem:[%s2608_s28 + $0x30] sm:$0x3] }
  0x1f   : > { %215 = vst [vmem:[%s180_s23 + $0xc] sm:$0x3] %v214_v6  ;;  %217 = vst [vmem:[%s180_s23 + $0xe] sm:$0x3] %v216_v7  ;;  %v220_v9 = vld [vmem:[%s2608_s28 + $0x36] sm:$0x3] }
  0x20   : > { %219 = vst [vmem:[%s180_s23 + $0x10] sm:$0x3] %v218_v8  ;;  %v222_v10 = vld [vmem:[%s2608_s28 + $0x3c] sm:$0x3]  ;;  %v224_v11 = vld [vmem:[%s2608_s28 + $0x42] sm:$0x3] }
  0x21   : > { %221 = vst [vmem:[%s180_s23 + $0x12] sm:$0x3] %v220_v9  ;;  %223 = vst [vmem:[%s180_s23 + $0x14] sm:$0x3] %v222_v10  ;;  %v226_v12 = vld [vmem:[%s2608_s28 + $0x48] sm:$0x3] }
  0x22   : > { %225 = vst [vmem:[%s180_s23 + $0x16] sm:$0x3] %v224_v11  ;;  %v228_v13 = vld [vmem:[%s2608_s28 + $0x4e] sm:$0x3]  ;;  %v230_v14 = vld [vmem:[%s2608_s28 + $0x54] sm:$0x3] }
  0x23   : > { %227 = vst [vmem:[%s180_s23 + $0x18] sm:$0x3] %v226_v12  ;;  %229 = vst [vmem:[%s180_s23 + $0x1a] sm:$0x3] %v228_v13  ;;  %v232_v15 = vld [vmem:[%s2608_s28 + $0x5a] sm:$0x3] }
  0x24   : > { %231 = vst [vmem:[%s180_s23 + $0x1c] sm:$0x3] %v230_v14  ;;  %233 = vst [vmem:[%s180_s23 + $0x1e] sm:$0x3] %v232_v15 }
  0x25 PF: > { %289 = sbr.rel (!%p2584_p6) target bundleno = 47 (0x2f), region = 61  ;;  %s291_s25 = sand.u32 (%p2584_p6), 1, %s2458_s13  }
  0x26   : > { %s2138_s29 = smul.u32 (%p2584_p6), 48, %s2582_s26  ;;  %s2136_s30 = sshll.u32 (%p2584_p6), %s291_s25, 4 }
  0x27   : > { %s293_s9 = scalar_lea.vmem (%p2584_p6), [#allocation8], %s2136_s30 }
  0x28   : > { %s2031_s8 = scalar_lea.vmem (%p2584_p6), %s3038_s1, %s2138_s29 }
  0x29   : > { %v2139_v16 = vld [vmem:[%s2031_s8 + $0x2] sm:$0x3] (%p2584_p6)  ;;  %v2140_v17 = vld [vmem:[%s2031_s8 + $0x8] sm:$0x3] (%p2584_p6)  ;;  %v2141_v18 = vld [vmem:[%s2031_s8 + $0xe] sm:$0x3] (%p2584_p6) }
  0x2a   : > { %319 = vst [vmem:[%s293_s9] sm:$0x3] %v2139_v16  ;;  %321 = vst [vmem:[%s293_s9 + $0x2] sm:$0x3] %v2140_v17  ;;  %v2142_v19 = vld [vmem:[%s2031_s8 + $0x14] sm:$0x3] }
  0x2b   : > { %323 = vst [vmem:[%s293_s9 + $0x4] sm:$0x3] %v2141_v18  ;;  %v2143_v20 = vld [vmem:[%s2031_s8 + $0x1a] sm:$0x3]  ;;  %v2144_v21 = vld [vmem:[%s2031_s8 + $0x20] sm:$0x3] }
  0x2c   : > { %325 = vst [vmem:[%s293_s9 + $0x6] sm:$0x3] %v2142_v19  ;;  %327 = vst [vmem:[%s293_s9 + $0x8] sm:$0x3] %v2143_v20  ;;  %v2145_v22 = vld [vmem:[%s2031_s8 + $0x26] sm:$0x3] }
  0x2d   : > { %329 = vst [vmem:[%s293_s9 + $0xa] sm:$0x3] %v2144_v21  ;;  %v2146_v23 = vld [vmem:[%s2031_s8 + $0x2c] sm:$0x3]  ;;  %331 = vst [vmem:[%s293_s9 + $0xc] sm:$0x3] %v2145_v22 }
  0x2e   : > { %333 = vst [vmem:[%s293_s9 + $0xe] sm:$0x3] %v2146_v23 }
  0x2f PF: > { %373 = sbr.rel (!%p2584_p6) target bundleno = 57 (0x39), region = 102  ;;  %s375_s10 = sand.u32 (%p2584_p6), 1, %s2458_s13  }
  0x30   : > { %s2149_s11 = smul.u32 (%p2584_p6), 48, %s2582_s26  ;;  %s2147_s24 = sshll.u32 (%p2584_p6), %s375_s10, 4 }
  0x31   : > { %s377_s29 = scalar_lea.vmem (%p2584_p6), [#allocation9], %s2147_s24 }
  0x32   : > { %s2040_s25 = scalar_lea.vmem (%p2584_p6), %s3039_s2, %s2149_s11 }
  0x33   : > { %v2150_v24 = vld [vmem:[%s2040_s25 + $0x4] sm:$0x3] (%p2584_p6)  ;;  %v2151_v25 = vld [vmem:[%s2040_s25 + $0xa] sm:$0x3] (%p2584_p6)  ;;  %v2152_v26 = vld [vmem:[%s2040_s25 + $0x10] sm:$0x3] (%p2584_p6) }
  0x34   : > { %403 = vst [vmem:[%s377_s29] sm:$0x3] %v2150_v24  ;;  %405 = vst [vmem:[%s377_s29 + $0x2] sm:$0x3] %v2151_v25  ;;  %v2153_v27 = vld [vmem:[%s2040_s25 + $0x16] sm:$0x3] }
  0x35   : > { %407 = vst [vmem:[%s377_s29 + $0x4] sm:$0x3] %v2152_v26  ;;  %v2154_v28 = vld [vmem:[%s2040_s25 + $0x1c] sm:$0x3]  ;;  %v2155_v29 = vld [vmem:[%s2040_s25 + $0x22] sm:$0x3] }
  0x36   : > { %409 = vst [vmem:[%s377_s29 + $0x6] sm:$0x3] %v2153_v27  ;;  %411 = vst [vmem:[%s377_s29 + $0x8] sm:$0x3] %v2154_v28  ;;  %v2156_v30 = vld [vmem:[%s2040_s25 + $0x28] sm:$0x3] }
  0x37   : > { %413 = vst [vmem:[%s377_s29 + $0xa] sm:$0x3] %v2155_v29  ;;  %v2157_v31 = vld [vmem:[%s2040_s25 + $0x2e] sm:$0x3]  ;;  %415 = vst [vmem:[%s377_s29 + $0xc] sm:$0x3] %v2156_v30 }
  0x38   : > { %417 = vst [vmem:[%s377_s29 + $0xe] sm:$0x3] %v2157_v31 }
  0x39 PF: > { %p2158_p10 = scmp.ge.s32.totalorder %s2486_s20, 1  ;;  %p456_p11 = scmp.lt.s32.totalorder %s2486_s20, 5 }
  0x3b   : > { %p457_p12 = pnand %p2158_p10, %p456_p11 }
  0x3c   : > { %s463_s26 = sand.u32 (!%p457_p12), 1, %s2462_s14   ;;  %s470_s27 = sand.u32 (!%p457_p12), 1, %s2454_s12  }
  0x3d   : > { %460 = sbr.rel (%p457_p12) target bundleno = 934 (0x3a6), region = 143  ;;  %s2159_s30 = sshll.u32 (!%p457_p12), %s463_s26, 5 }
  0x3e   : > { %s2160_s4 = sshll.u32 (!%p457_p12), %s470_s27, 4  ;;  %s2162_s5 = sshll.u32 (!%p457_p12), %s2474_s17, 4 }
  0x3f   : > { %p521_p13 = scmp.lt.s32.totalorder (!%p457_p12), %s2162_s5, 31  ;;  %p529_p0 = scmp.eq.s32.totalorder (!%p457_p12), %s2470_s16, 0 }
  0x40   : > { %s465_s24 = scalar_lea.vmem (!%p457_p12), [#allocation7], %s2159_s30  ;;  %s2651_s28 = scalar_lea.vmem (!%p457_p12), [#allocation8], %s2160_s4 }
  0x41   : > { %s2653_s23 = scalar_lea.vmem (!%p457_p12), [#allocation9], %s2160_s4 }
  0x42   : > { %s3058_s5 = smov (!%p521_p13, %s2162_s5), 31  ;;  %534 = sbr.rel (!%p529_p0) target bundleno = 99 (0x63), region = 159  ;;  %v555_v32 = vlaneseq (%p529_p0)  ;;  %v2400_v34 = vld.sshfl [vmem:[%s465_s24] sm:$0x33 pattern:$0x73516240] (%p529_p0) }
  0x43   : > { %s2163_s8 = sshll.u32 %s3058_s5, 1  ;;  %v2401_v35 = vld.sshfl [vmem:[%s465_s24 + $0x2] sm:$0x33 pattern:$0x73516240] (%p529_p0)  ;;  %vm791_vm0 = vcmask (%p529_p0), 60416  }
  0x44   : > { %s2649_s11 = scalar_lea.vmem %s3040_s3, %s2163_s8  ;;  %v556_v33 = vshrl.u32 (%p529_p0), %v555_v32, 7  ;;  %v2402_v36 = vld.sshfl [vmem:[%s465_s24 + $0x8] sm:$0x33 pattern:$0x73516240] (%p529_p0)  ;;  %vm800_vm1 = vcmask (%p529_p0), 64512   ;;  %v625_v47 = vpack.i.b16 (%p529_p0), %v2401_v35, %v2400_v34 }
  0x45   : > { %v2403_v37 = vld.sshfl [vmem:[%s465_s24 + $0xa] sm:$0x33 pattern:$0x73516240] (%p529_p0)  ;;  %v2488_v38 = vmov (%p529_p0), 1983009808  }
  0x46   : > { %v721_v39 = vunpack.c.l.s4 (%p529_p0), %v2488_v38  ;;  %v2404_v41 = vld.sshfl [vmem:[%s465_s24 + $0x10] sm:$0x33 pattern:$0x73516240] (%p529_p0)  ;;  %v2489_v46 = vmov (%p529_p0), 0.0   ;;  %v641_v48 = vpack.i.b16 (%p529_p0), %v2403_v37, %v2402_v36  ;;  %v627_v49 = vshrl.u32 (%p529_p0), %v2400_v34, 16 }
  0x47   : > { %v2405_v42 = vld.sshfl [vmem:[%s465_s24 + $0x12] sm:$0x33 pattern:$0x73516240]  ;;  %801 = vst.msk [vmem:[#allocation6] sm:$0xff] %vm800_vm1, %v2489_v46  ;;  %802 = vst.msk [vmem:[#allocation6 + $0x8] sm:$0xff] %vm800_vm1, %v2489_v46 }
  0x48   : > { %v722_v40 = vunpack.c.0.s8 %v721_v39  ;;  %v2406_v43 = vld.sshfl [vmem:[%s465_s24 + $0x18] sm:$0x33 pattern:$0x73516240]  ;;  %803 = vst.msk [vmem:[#allocation6 + $0x10] sm:$0xff] %vm800_vm1, %v2489_v46  ;;  %804 = vst.msk [vmem:[#allocation6 + $0x18] sm:$0xff] %vm800_vm1, %v2489_v46  ;;  %v657_v51 = vpack.i.b16 %v2405_v42, %v2404_v41 }
  0x49   : > { %v2407_v44 = vld.sshfl [vmem:[%s465_s24 + $0x1a] sm:$0x33 pattern:$0x73516240]  ;;  %805 = vst.msk [vmem:[#allocation6 + $0x20] sm:$0xff] %vm800_vm1, %v2489_v46  ;;  %806 = vst.msk [vmem:[#allocation6 + $0x28] sm:$0xff] %vm800_vm1, %v2489_v46 }
  0x4a   : > { %v2655_v45 = vsub.s32 %v722_v40, %v556_v33  ;;  %807 = vst.msk [vmem:[#allocation6 + $0x30] sm:$0xff] %vm800_vm1, %v2489_v46  ;;  %808 = vst.msk [vmem:[#allocation6 + $0x38] sm:$0xff] %vm800_vm1, %v2489_v46  ;;  %v628_v50 = vshrl.u32 %v2401_v35, 16  ;;  %v673_v52 = vpack.i.b16 %v2407_v44, %v2406_v43  ;;  %v643_v53 = vshrl.u32 %v2402_v36, 16 }
  0x4b   : > { %v644_v54 = vshrl.u32 %v2403_v37, 16  ;;  %v687_v55 = vmul.bf16 1052065461, %v625_v47  ;;  %v688_v56 = vmul.bf16 1052065461, %v641_v48  ;;  %v659_v58 = vshrl.u32 %v2404_v41, 16 }
  0x4c   : > { %v629_v57 = vpack.i.b16 %v628_v50, %v627_v49  ;;  %v689_v59 = vmul.bf16 1052065461, %v657_v51  ;;  %v690_v60 = vmul.bf16 1052065461, %v673_v52  ;;  %v660_v62 = vshrl.u32 %v2405_v42, 16 }
  0x4d   : > { %v645_v61 = vpack.i.b16 %v644_v54, %v643_v53  ;;  %v719_v63 = vcombine.low %v687_v55, %v688_v56  ;;  %v675_v1 = vshrl.u32 %v2406_v43, 16  ;;  %v676_v2 = vshrl.u32 %v2407_v44, 16 }
  0x4e   : > { %v691_v0 = vmul.bf16 1052065461, %v629_v57  ;;  %v727_v3 = vcombine.low %v689_v59, %v690_v60  ;;  %v661_v5 = vpack.i.b16 %v660_v62, %v659_v58  ;;  %v2490_v6 = vmov 0  }
  0x4f   : > { %v692_v4 = vmul.bf16 1052065461, %v645_v61  ;;  %v559_v7 = vcombine.high %v2400_v34, %v2490_v6  ;;  %v726_v8 = vrot.slane %v719_v63, %v2655_v45  ;;  %v677_v9 = vpack.i.b16 %v676_v2, %v675_v1 }
  0x50   : > { %v568_v10 = vcombine.high %v2401_v35, %v2490_v6  ;;  %v577_v11 = vcombine.high %v2402_v36, %v2490_v6  ;;  %v734_v12 = vrot.slane %v727_v3, %v2655_v45  ;;  %v693_v14 = vmul.bf16 1052065461, %v661_v5 }
  0x51   : > { %v735_v13 = vcombine.low %v691_v0, %v692_v4  ;;  %v586_v15 = vcombine.high %v2403_v37, %v2490_v6  ;;  %792 = vst.msk [vmem:[#allocation2] sm:$0xf] %vm791_vm0, %v726_v8  ;;  %v694_v16 = vmul.bf16 1052065461, %v677_v9  ;;  %v595_v18 = vcombine.high %v2404_v41, %v2490_v6 }
  0x52   : > { %v633_v17 = vpack.i.b16 %v568_v10, %v559_v7  ;;  %v604_v19 = vcombine.high %v2405_v42, %v2490_v6  ;;  %793 = vst.msk [vmem:[#allocation2 + $0x4] sm:$0xf] %vm791_vm0, %v734_v12  ;;  %v613_v22 = vcombine.high %v2406_v43, %v2490_v6  ;;  %v622_v23 = vcombine.high %v2407_v44, %v2490_v6 }
  0x53   : > { %v742_v20 = vrot.slane %v735_v13, %v2655_v45  ;;  %v649_v21 = vpack.i.b16 %v586_v15, %v577_v11  ;;  %v743_v24 = vcombine.low %v693_v14, %v694_v16  ;;  %v635_v27 = vshrl.u32 %v559_v7, 16 }
  0x54   : > { %v695_v25 = vmul.bf16 1052065461, %v633_v17  ;;  %v665_v26 = vpack.i.b16 %v604_v19, %v595_v18  ;;  %v681_v29 = vpack.i.b16 %v622_v23, %v613_v22  ;;  %v636_v30 = vshrl.u32 %v568_v10, 16 }
  0x55   : > { %794 = vst.msk [vmem:[#allocation2 + $0x8] sm:$0xf] %vm791_vm0, %v742_v20  ;;  %v696_v28 = vmul.bf16 1052065461, %v649_v21  ;;  %v651_v31 = vshrl.u32 %v577_v11, 16  ;;  %v750_v32 = vrot.slane %v743_v24, %v2655_v45  ;;  %v652_v34 = vshrl.u32 %v586_v15, 16 }
  0x56   : > { %v697_v33 = vmul.bf16 1052065461, %v665_v26  ;;  %v667_v35 = vshrl.u32 %v595_v18, 16  ;;  %v698_v37 = vmul.bf16 1052065461, %v681_v29  ;;  %v637_v38 = vpack.i.b16 %v636_v30, %v635_v27 }
  0x57   : > { %v751_v36 = vcombine.low %v695_v25, %v696_v28  ;;  %v668_v39 = vshrl.u32 %v604_v19, 16  ;;  %795 = vst.msk [vmem:[#allocation2 + $0xc] sm:$0xf] %vm791_vm0, %v750_v32  ;;  %v653_v40 = vpack.i.b16 %v652_v34, %v651_v31  ;;  %v683_v41 = vshrl.u32 %v613_v22, 16 }
  0x58   : > { %v684_v42 = vshrl.u32 %v622_v23, 16  ;;  %v759_v44 = vcombine.low %v697_v33, %v698_v37  ;;  %v699_v46 = vmul.bf16 1052065461, %v637_v38 }
  0x59   : > { %v758_v43 = vrot.slane %v751_v36, %v2655_v45  ;;  %v669_v47 = vpack.i.b16 %v668_v39, %v667_v35  ;;  %v700_v48 = vmul.bf16 1052065461, %v653_v40 }
  0x5a   : > { %v685_v49 = vpack.i.b16 %v684_v42, %v683_v41  ;;  %v766_v50 = vrot.slane %v759_v44, %v2655_v45 }
  0x5b   : > { %796 = vst.msk [vmem:[#allocation2 + $0x10] sm:$0xf] %vm791_vm0, %v758_v43  ;;  %v701_v51 = vmul.bf16 1052065461, %v669_v47  ;;  %v767_v52 = vcombine.low %v699_v46, %v700_v48 }
  0x5c   : > { %v702_v53 = vmul.bf16 1052065461, %v685_v49  ;;  %797 = vst.msk [vmem:[#allocation2 + $0x14] sm:$0xf] %vm791_vm0, %v766_v50 }
  0x5d   : > { %v774_v54 = vrot.slane %v767_v52, %v2655_v45 }
  0x5e   : > { %v775_v55 = vcombine.low %v701_v51, %v702_v53 }
  0x5f   : > { %798 = vst.msk [vmem:[#allocation2 + $0x18] sm:$0xf] %vm791_vm0, %v774_v54 }
  0x60   : > { %v782_v56 = vrot.slane %v775_v55, %v2655_v45 }
  0x62   : > { %799 = vst.msk [vmem:[#allocation2 + $0x1c] sm:$0xf] %vm791_vm0, %v782_v56 }
  0x63 PF: > { %vm829_vm2 = vcmask 64512   ;;  %v858_v57 = vlaneseq  ;;  %v2491_v58 = vmov 0.0   ;;  %v2408_v59 = vld.sshfl [vmem:[%s2651_s28] sm:$0x33 pattern:$0x73516240] }
  0x64   : > { %2198 = vmatprep.subr.bf16.mxu0 %v2491_v58  ;;  %830 = vst.msk [vmem:[#allocation5] sm:$0xff] %vm829_vm2, %v2491_v58  ;;  %831 = vst.msk [vmem:[#allocation5 + $0x8] sm:$0xff] %vm829_vm2, %v2491_v58  ;;  %2204 = vmatprep.subr.bf16.mxu1 %v2491_v58  ;;  %v2492_v60 = vmov 1934713408   ;;  %vm2493_vm3 = vmmov 0   ;;  %v2495_v4 = vmov 0  }
  0x65   : > { %832 = vst.msk [vmem:[#allocation5 + $0x10] sm:$0xff] %vm829_vm2, %v2491_v58  ;;  %833 = vst.msk [vmem:[#allocation5 + $0x18] sm:$0xff] %vm829_vm2, %v2491_v58  ;;  %v859_v45 = vshrl.u32 %v858_v57, 7  ;;  %v856_v61 = vunpack.c.l.s4 %v2492_v60  ;;  %2200 = vmatprep.mubr.msk.bf16.mxu0 %vm2493_vm3, %v2491_v58  ;;  %2206 = vmatprep.mubr.msk.bf16.mxu1 %vm2493_vm3, %v2491_v58  ;;  %v2494_v2 = vmov 1983009808   ;;  %v893_v10 = vshrl.u32 %v2408_v59, 16 }
  0x66   : > { %834 = vst.msk [vmem:[#allocation5 + $0x20] sm:$0xff] %vm829_vm2, %v2491_v58  ;;  %835 = vst.msk [vmem:[#allocation5 + $0x28] sm:$0xff] %vm829_vm2, %v2491_v58  ;;  %v2409_v62 = vld.sshfl [vmem:[%s2651_s28 + $0x2] sm:$0x33 pattern:$0x73516240]  ;;  %v989_v3 = vunpack.c.l.s4 %v2494_v2  ;;  %2338 = vset.pattern.permute.xlu0 %v2495_v4  ;;  %2339 = vset.pattern.permute.xlu1 %v2495_v4  ;;  %v862_v14 = vcombine.high %v2408_v59, %v2495_v4 }
  0x67   : > { %836 = vst.msk [vmem:[#allocation5 + $0x30] sm:$0xff] %vm829_vm2, %v2491_v58  ;;  %837 = vst.msk [vmem:[#allocation5 + $0x38] sm:$0xff] %vm829_vm2, %v2491_v58  ;;  %v2410_v63 = vld.sshfl [vmem:[%s2651_s28 + $0x8] sm:$0x33 pattern:$0x73516240]  ;;  %v857_v1 = vunpack.c.0.s8 %v856_v61  ;;  %v892_v8 = vpack.i.b16 %v2409_v62, %v2408_v59  ;;  %v871_v15 = vcombine.high %v2409_v62, %v2495_v4 }
  0x68   : > { %v2411_v0 = vld.sshfl [vmem:[%s2651_s28 + $0xa] sm:$0x33 pattern:$0x73516240]  ;;  %v990_v6 = vunpack.c.0.s8 %v989_v3  ;;  %v894_v11 = vshrl.u32 %v2409_v62, 16  ;;  %v905_v12 = vshrl.u32 %v2410_v63, 16  ;;  %v880_v18 = vcombine.high %v2410_v63, %v2495_v4 }
  0x69   : > { %v2701_v5 = vsub.s32 %v857_v1, %v859_v45  ;;  %v904_v9 = vpack.i.b16 %v2411_v0, %v2410_v63  ;;  %v906_v13 = vshrl.u32 %v2411_v0, 16  ;;  %v889_v19 = vcombine.high %v2411_v0, %v2495_v4  ;;  %v2344_v37 = vld [vmem:[#allocation2] sm:$0xff]   ;;  %v2345_v40 = vld [vmem:[#allocation2 + $0x8] sm:$0xff]   ;;  %v2346_v42 = vld [vmem:[#allocation2 + $0x10] sm:$0xff]   ;;  %p1812_p1 = scmp.eq.s32.totalorder %s2470_s16, 1 }
  0x6a   : > { %v2703_v7 = vsub.s32 %v990_v6, %v859_v45  ;;  %v895_v17 = vpack.i.b16 %v894_v11, %v893_v10  ;;  %v898_v21 = vpack.i.b16 %v871_v15, %v862_v14  ;;  %v899_v22 = vshrl.u32 %v862_v14, 16  ;;  %v2347_v43 = vld [vmem:[#allocation2 + $0x18] sm:$0xff]  }
  0x6b   : > { %v987_v16 = vcombine.low %v892_v8, %v904_v9  ;;  %v907_v20 = vpack.i.b16 %v906_v13, %v905_v12  ;;  %v900_v23 = vshrl.u32 %v871_v15, 16  ;;  %v910_v25 = vpack.i.b16 %v889_v19, %v880_v18 }
  0x6c   : > { %v911_v26 = vshrl.u32 %v880_v18, 16  ;;  %v912_v27 = vshrl.u32 %v889_v19, 16  ;;  %vm812_vm4 = vcmask 7168   ;;  %v2496_v53 = vmov -inf  }
  0x6d   : > { %v994_v24 = vrot.slane %v987_v16, %v2703_v7  ;;  %v1048_v28 = vcombine.low %v895_v17, %v907_v20  ;;  %v901_v29 = vpack.i.b16 %v900_v23, %v899_v22  ;;  %v1108_v31 = vcombine.low %v898_v21, %v910_v25  ;;  %813 = vst.msk [vmem:[#allocation3] sm:$0xff] %vm812_vm4, %v2496_v53 }
  0x6e   : > { %v913_v32 = vpack.i.b16 %v912_v27, %v911_v26  ;;  %814 = vst.msk [vmem:[#allocation3 + $0x8] sm:$0xff] %vm812_vm4, %v2496_v53  ;;  %815 = vst.msk [vmem:[#allocation3 + $0x10] sm:$0xff] %vm812_vm4, %v2496_v53  ;;  %vm1479_vm5 = vcmask 1043456   ;;  %vm1977_vm6 = vcmask (%p1812_p1), 58368  }
  0x6f   : > { %v1000_v30 = vsel %vm829_vm2, %v994_v24, 0  ;;  %v1055_v33 = vrot.slane %v1048_v28, %v2703_v7  ;;  %v1115_v34 = vrot.slane %v1108_v31, %v2703_v7  ;;  %816 = vst.msk [vmem:[#allocation3 + $0x18] sm:$0xff] %vm812_vm4, %v2496_v53  ;;  %817 = vst.msk [vmem:[#allocation3 + $0x20] sm:$0xff] %vm812_vm4, %v2496_v53 }
  0x70   : > { %2199 = vmatpush3.bf16.xpose.msra.mxu0 %v1000_v30  ;;  %v1168_v35 = vcombine.low %v901_v29, %v913_v32  ;;  %818 = vst.msk [vmem:[#allocation3 + $0x28] sm:$0xff] %vm812_vm4, %v2496_v53  ;;  %819 = vst.msk [vmem:[#allocation3 + $0x30] sm:$0xff] %vm812_vm4, %v2496_v53 }
  0x71   : > { %2210 = vmatprep.subr.bf16.mxu0 %v2491_v58  ;;  %v1060_v36 = vsel %vm829_vm2, %v1055_v33, 0  ;;  %v1120_v39 = vsel %vm829_vm2, %v1115_v34, 0  ;;  %820 = vst.msk [vmem:[#allocation3 + $0x38] sm:$0xff] %vm812_vm4, %v2496_v53  ;;  %821 = vst.msk [vmem:[#allocation4] sm:$0xff] %vm812_vm4, %v2491_v58 }
  0x72   : > { %2205 = vmatpush3.bf16.xpose.msra.mxu1 %v1060_v36  ;;  %v1175_v38 = vrot.slane %v1168_v35, %v2703_v7  ;;  %822 = vst.msk [vmem:[#allocation4 + $0x8] sm:$0xff] %vm812_vm4, %v2491_v58  ;;  %823 = vst.msk [vmem:[#allocation4 + $0x10] sm:$0xff] %vm812_vm4, %v2491_v58  ;;  %v2412_v33 = vld.sshfl [vmem:[%s2653_s23] sm:$0x33 pattern:$0x73516240] }
  0x73   : > { %2216 = vmatprep.subr.bf16.mxu1 %v2491_v58  ;;  %824 = vst.msk [vmem:[#allocation4 + $0x18] sm:$0xff] %vm812_vm4, %v2491_v58  ;;  %825 = vst.msk [vmem:[#allocation4 + $0x20] sm:$0xff] %vm812_vm4, %v2491_v58  ;;  %v2413_v34 = vld.sshfl [vmem:[%s2653_s23 + $0x2] sm:$0x33 pattern:$0x73516240] }
  0x74   : > { %v1180_v41 = vsel %vm829_vm2, %v1175_v38, 0  ;;  %826 = vst.msk [vmem:[#allocation4 + $0x28] sm:$0xff] %vm812_vm4, %v2491_v58  ;;  %827 = vst.msk [vmem:[#allocation4 + $0x30] sm:$0xff] %vm812_vm4, %v2491_v58  ;;  %v2789_v9 = vld [vmem:[#allocation3] sm:$0xff] }
  0x75   : > { %828 = vst.msk [vmem:[#allocation4 + $0x38] sm:$0xff] %vm812_vm4, %v2491_v58  ;;  %v2794_v12 = vld [vmem:[#allocation3 + $0x10] sm:$0xff]  ;;  %v2796_v13 = vld [vmem:[#allocation3 + $0x8] sm:$0xff] }
  0x76   : > { %v2809_v19 = vld [vmem:[#allocation3 + $0x18] sm:$0xff]  ;;  %v2816_v21 = vld [vmem:[#allocation3 + $0x20] sm:$0xff] }
  0x77   : > { %2201 = vmatmul.mubr.msk.bf16.vlgmr.msra.gmra.mxu0 %vm829_vm2, %v2344_v37  ;;  %v2833_v28 = vld [vmem:[#allocation3 + $0x28] sm:$0xff]  ;;  %v2835_v29 = vld [vmem:[#allocation3 + $0x30] sm:$0xff] }
  0x78   : > { %2211 = vmatpush3.bf16.xpose.msra.mxu0 %v1120_v39  ;;  %2212 = vmatprep.mubr.msk.bf16.mxu0 %vm2493_vm3, %v2491_v58  ;;  %v2414_v37 = vld.sshfl [vmem:[%s2653_s23 + $0x8] sm:$0x33 pattern:$0x73516240] }
  0x79   : > { %2222 = vmatprep.subr.bf16.mxu0 %v2491_v58  ;;  %2207 = vmatmul.mubr.msk.bf16.vlgmr.msra.gmra.mxu1 %vm829_vm2, %v2345_v40  ;;  %v2415_v38 = vld.sshfl [vmem:[%s2653_s23 + $0xa] sm:$0x33 pattern:$0x73516240] }
  0x7a   : > { %2217 = vmatpush3.bf16.xpose.msra.mxu1 %v1180_v41  ;;  %2218 = vmatprep.mubr.msk.bf16.mxu1 %vm2493_vm3, %v2491_v58  ;;  %v2852_v39 = vld [vmem:[#allocation3 + $0x38] sm:$0xff] }
  0x7b   : > { %2228 = vmatprep.subr.bf16.mxu1 %v2491_v58 }
  0x7f   : > { %2213 = vmatmul.mubr.msk.bf16.vlgmr.msra.gmra.mxu0 %vm829_vm2, %v2346_v42 }
  0x80   : > { %2224 = vmatprep.mubr.msk.bf16.mxu0 %vm2493_vm3, %v2491_v58 }
  0x81   : > { %2219 = vmatmul.mubr.msk.bf16.vlgmr.msra.gmra.mxu1 %vm829_vm2, %v2347_v43  ;;  %v960_v43 = vpack.i.b16 %v2413_v34, %v2412_v33 }
  0x82   : > { %2230 = vmatprep.mubr.msk.bf16.mxu1 %vm2493_vm3, %v2491_v58 }
 0x137   : > { %v2733_v44 = vpop.f32.mrf.mxu0 }
 0x138   : > { %v1231_v46 = vsel %vm829_vm2, %v2733_v44, -inf }
 0x139   : > { %1232 = vmax.xlane.f32.xlu0 %v1231_v46  ;;  %v2202_v47 = vpop.f32.mrf.mxu0  ;;  %v2737_v48 = vpop.f32.mrf.mxu1 }
 0x13a   : > { %v1237_v49 = vsel %vm829_vm2, %v2737_v48, -inf  ;;  %v972_v47 = vpack.i.b16 %v2415_v38, %v2414_v37 }
 0x13b   : > { %v2741_v50 = vpop.f32.mrf.mxu0  ;;  %1238 = vmax.xlane.f32.xlu1 %v1237_v49  ;;  %v2208_v51 = vpop.f32.mrf.mxu1  ;;  %v961_v49 = vshrl.u32 %v2412_v33, 16 }
 0x13c   : > { %v1234_v52 = vsel %vm829_vm2, %v2741_v50, -inf  ;;  %v962_v51 = vshrl.u32 %v2413_v34, 16 }
 0x13d   : > { %1235 = vmax.xlane.f32.xlu0 %v1234_v52  ;;  %v2203_v54 = vpop.f32.mrf.mxu0  ;;  %v2769_v55 = vpop.f32.mrf.mxu1  ;;  %v973_v52 = vshrl.u32 %v2414_v37, 16 }
 0x13e   : > { %v1240_v56 = vsel %vm829_vm2, %v2769_v55, -inf  ;;  %v974_v54 = vshrl.u32 %v2415_v38, 16 }
 0x13f   : > { %v2773_v57 = vpop.f32.mrf.mxu0  ;;  %1241 = vmax.xlane.f32.xlu1 %v1240_v56  ;;  %v2209_v45 = vpop.f32.mrf.mxu1  ;;  %v1468_v56 = vcombine.low %v960_v43, %v972_v47 }
 0x140   : > { %v1243_v59 = vsel %vm829_vm2, %v2773_v57, -inf  ;;  %v963_v45 = vpack.i.b16 %v962_v51, %v961_v49 }
 0x141   : > { %v2214_v60 = vpop.f32.mrf.mxu0  ;;  %1244 = vmax.xlane.f32.xlu0 %v1243_v59  ;;  %v2777_v61 = vpop.f32.mrf.mxu1  ;;  %v975_v59 = vpack.i.b16 %v974_v54, %v973_v52 }
 0x142   : > { %v1249_v63 = vsel %vm829_vm2, %v2777_v61, -inf  ;;  %v1475_v60 = vrot.slane %v1468_v56, %v2703_v7 }
 0x143   : > { %v2779_v62 = vpop.f32.mrf.mxu0  ;;  %v2220_v0 = vpop.f32.mrf.mxu1 }
 0x144   : > { %v1246_v1 = vsel %vm829_vm2, %v2779_v62, -inf  ;;  %v1481_v0 = vsel %vm1479_vm5, %v1475_v60, 0 }
 0x145   : > { %v2215_v2 = vpop.f32.mrf.mxu0  ;;  %1247 = vmax.xlane.f32.xlu1 %v1246_v1  ;;  %1250 = vmax.xlane.f32.xlu0 %v1249_v63  ;;  %v2785_v3 = vpop.f32.mrf.mxu1  ;;  %v1524_v63 = vcombine.low %v963_v45, %v975_v59 }
 0x146   : > { %v1252_v6 = vsel %vm829_vm2, %v2785_v3, -inf  ;;  %2223 = vmatpush3.bf16.msra.mxu0 %v1481_v0 }
 0x147   : > { %v2221_v8 = vpop.f32.mrf.mxu1  ;;  %v1531_v1 = vrot.slane %v1524_v63, %v2703_v7  ;;  %2234 = vmatprep.subr.bf16.mxu0 %v2491_v58 }
 0x148   : > { %v939_v8 = vcombine.high %v2413_v34, %v2495_v4 }
 0x149   : > { %1253 = vmax.xlane.f32.xlu1 %v1252_v6  ;;  %v1536_v2 = vsel %vm1479_vm5, %v1531_v1, 0  ;;  %v930_v6 = vcombine.high %v2412_v33, %v2495_v4 }
 0x14a   : > { %2229 = vmatpush3.bf16.msra.mxu1 %v1536_v2 }
 0x14b   : > { %2240 = vmatprep.subr.bf16.mxu1 %v2491_v58 }
 0x1c2   : > { %v1233_v10 = vpop.xlane.xlu0 %1232 }
 0x1c3   : > { %v2792_v11 = vmax.f32 %v2789_v9, %v1233_v10  ;;  %v948_v10 = vcombine.high %v2414_v37, %v2495_v4 }
 0x1c4   : > { %v1239_v15 = vpop.xlane.xlu1 %1238 }
 0x1c5   : > { %v1263_v14 = vsub.f32 %v2789_v9, %v2792_v11  ;;  %1705 = vst.msk [vmem:[#allocation3] sm:$0xff] %vm812_vm4, %v2792_v11  ;;  %1289 = vperm.xlu0 %2338, %v2792_v11   ;;  %v2804_v16 = vmax.f32 %v2794_v12, %v1239_v15  ;;  %v957_v15 = vcombine.high %v2415_v38, %v2495_v4 }
 0x1c6   : > { %v1236_v17 = vpop.xlane.xlu0 %1235 }
 0x1c7   : > { %v2807_v18 = vmax.f32 %v2796_v13, %v1236_v17  ;;  %v1265_v20 = vsub.f32 %v2794_v12, %v2804_v16  ;;  %1707 = vst.msk [vmem:[#allocation3 + $0x10] sm:$0xff] %vm812_vm4, %v2804_v16  ;;  %1299 = vperm.xlu1 %2339, %v2804_v16   ;;  %v966_v17 = vpack.i.b16 %v939_v8, %v930_v6  ;;  %v980_v43 = vshrl.u32 %v957_v15, 16 }
 0x1c8   : > { %v1242_v23 = vpop.xlane.xlu1 %1241 }
 0x1c9   : > { %v1264_v22 = vsub.f32 %v2796_v13, %v2807_v18  ;;  %1706 = vst.msk [vmem:[#allocation3 + $0x8] sm:$0xff] %vm812_vm4, %v2807_v18  ;;  %v2823_v24 = vmax.f32 %v2809_v19, %v1242_v23  ;;  %v978_v23 = vpack.i.b16 %v957_v15, %v948_v10  ;;  %v1275_v9 = vmul.f32 1.442695, %v1265_v20 }
 0x1ca   : > { %v1245_v25 = vpop.xlane.xlu0 %1244 }
 0x1cb   : > { %v2826_v26 = vmax.f32 %v2816_v21, %v1245_v25  ;;  %v1266_v27 = vsub.f32 %v2809_v19, %v2823_v24  ;;  %1708 = vst.msk [vmem:[#allocation3 + $0x18] sm:$0xff] %vm812_vm4, %v2823_v24  ;;  %1294 = vperm.xlu1 %2339, %v2807_v18   ;;  %v1579_v25 = vcombine.low %v966_v17, %v978_v23 }
 0x1cd   : > { %v1267_v30 = vsub.f32 %v2816_v21, %v2826_v26  ;;  %1709 = vst.msk [vmem:[#allocation3 + $0x20] sm:$0xff] %vm812_vm4, %v2826_v26  ;;  %v1586_v47 = vrot.slane %v1579_v25, %v2703_v7 }
 0x1ce   : > { %v1248_v31 = vpop.xlane.xlu1 %1247  ;;  %v1251_v32 = vpop.xlane.xlu0 %1250 }
 0x1cf   : > { %v2844_v35 = vmax.f32 %v2833_v28, %v1248_v31  ;;  %v2847_v36 = vmax.f32 %v2835_v29, %v1251_v32  ;;  %1304 = vperm.xlu1 %2339, %v2823_v24   ;;  %v967_v31 = vshrl.u32 %v930_v6, 16  ;;  %v968_v32 = vshrl.u32 %v939_v8, 16 }
 0x1d0   : > { %v1591_v52 = vsel %vm1479_vm5, %v1586_v47, 0  ;;  %v1279_v13 = vmul.f32 1.442695, %v1267_v30 }
 0x1d1   : > { %v1268_v40 = vsub.f32 %v2833_v28, %v2844_v35  ;;  %1710 = vst.msk [vmem:[#allocation3 + $0x28] sm:$0xff] %vm812_vm4, %v2844_v35  ;;  %v1269_v41 = vsub.f32 %v2835_v29, %v2847_v36  ;;  %1711 = vst.msk [vmem:[#allocation3 + $0x30] sm:$0xff] %vm812_vm4, %v2847_v36  ;;  %v969_v49 = vpack.i.b16 %v968_v32, %v967_v31  ;;  %v1353_v29 = vld [vmem:[#allocation4 + $0x10] sm:$0xff] }
 0x1d2   : > { %v1254_v42 = vpop.xlane.xlu1 %1253 }
 0x1d3   : > { %v2863_v46 = vmax.f32 %v2852_v39, %v1254_v42  ;;  %1309 = vperm.xlu1 %2339, %v2826_v26   ;;  %v979_v42 = vshrl.u32 %v948_v10, 16  ;;  %v1281_v11 = vmul.f32 1.442695, %v1268_v40  ;;  %v1283_v12 = vmul.f32 1.442695, %v1269_v41  ;;  %v1352_v40 = vld [vmem:[#allocation4 + $0x8] sm:$0xff] }
 0x1d5   : > { %v1270_v53 = vsub.f32 %v2852_v39, %v2863_v46  ;;  %1712 = vst.msk [vmem:[#allocation3 + $0x38] sm:$0xff] %vm812_vm4, %v2863_v46  ;;  %v981_v51 = vpack.i.b16 %v980_v43, %v979_v42 }
 0x1d7   : > { %1319 = vperm.xlu1 %2339, %v2847_v36   ;;  %v1634_v33 = vcombine.low %v969_v49, %v981_v51 }
 0x1d9   : > { %v1641_v34 = vrot.slane %v1634_v33, %v2703_v7 }
 0x1db   : > { %1314 = vperm.xlu1 %2339, %v2844_v35   ;;  %v1646_v37 = vsel %vm1479_vm5, %v1641_v34, 0 }
 0x1df   : > { %1324 = vperm.xlu1 %2339, %v2863_v46  }
 0x240   : > { %v1290_v54 = vpop.permute.xlu0 %1289 }
 0x241   : > { %v1327_v4 = vsub.f32 %v2733_v44, %v1290_v54 }
 0x242   : > { %v1300_v56 = vpop.permute.xlu1 %1299 }
 0x243   : > { %v1335_v38 = vmul.f32 1.442695, %v1327_v4  ;;  %v1329_v45 = vsub.f32 %v2737_v48, %v1300_v56 }
 0x245   : > { %2352 = vpow2.f32 %v1335_v38  ;;  %v1339_v59 = vmul.f32 1.442695, %v1329_v45 }
 0x246   : > { %v1295_v60 = vpop.permute.xlu1 %1294 }
 0x247   : > { %2354 = vpow2.f32 %v1339_v59  ;;  %v1328_v63 = vsub.f32 %v2741_v50, %v1295_v60  ;;  %v1271_v59 = vmul.f32 1.442695, %v1263_v14  ;;  %v1285_v14 = vmul.f32 1.442695, %v1270_v53 }
 0x249   : > { %v1337_v0 = vmul.f32 1.442695, %v1328_v63 }
 0x24a   : > { %v1305_v1 = vpop.permute.xlu1 %1304 }
 0x24b   : > { %2356 = vpow2.f32 %v1337_v0  ;;  %v1330_v2 = vsub.f32 %v2769_v55, %v1305_v1  ;;  %v1277_v0 = vmul.f32 1.442695, %v1266_v27  ;;  %v1351_v27 = vld [vmem:[#allocation4] sm:$0xff]  ;;  %v1354_v1 = vld [vmem:[#allocation4 + $0x18] sm:$0xff] }
 0x24d   : > { %v1341_v6 = vmul.f32 1.442695, %v1330_v2 }
 0x24e   : > { %v1310_v8 = vpop.permute.xlu1 %1309 }
 0x24f   : > { %2358 = vpow2.f32 %v1341_v6  ;;  %v1331_v44 = vsub.f32 %v2773_v57, %v1310_v8 }
 0x251   : > { %v1343_v15 = vmul.f32 1.442695, %v1331_v44 }
 0x252   : > { %v2353_v10 = vpop.eup %2352  ;;  %v1320_v17 = vpop.permute.xlu1 %1319 }
 0x253   : > { %v1367_v48 = vsel %vm829_vm2, %v2353_v10, 0.0  ;;  %2360 = vpow2.f32 %v1343_v15  ;;  %v1333_v23 = vsub.f32 %v2777_v61, %v1320_v17 }
 0x254   : > { %1368 = vadd.xlane.f32.xlu1 %v1367_v48  ;;  %v2355_v50 = vpop.eup %2354 }
 0x255   : > { %v1347_v25 = vmul.f32 1.442695, %v1333_v23  ;;  %v1373_v31 = vsel %vm829_vm2, %v2355_v50, 0.0 }
 0x256   : > { %v1315_v32 = vpop.permute.xlu1 %1314  ;;  %1374 = vadd.xlane.f32.xlu0 %v1373_v31 }
 0x257   : > { %2362 = vpow2.f32 %v1347_v25  ;;  %v1332_v55 = vsub.f32 %v2779_v62, %v1315_v32 }
 0x258   : > { %v2357_v42 = vpop.eup %2356 }
 0x259   : > { %v1345_v57 = vmul.f32 1.442695, %v1332_v55  ;;  %v1370_v43 = vsel %vm829_vm2, %v2357_v42, 0.0  ;;  %v1464_v47 = vpack.c.bf16 %v2357_v42, %v2353_v10  ;;  %v1355_v10 = vld [vmem:[#allocation4 + $0x20] sm:$0xff]  ;;  %v1356_v42 = vld [vmem:[#allocation4 + $0x28] sm:$0xff] }
 0x25a   : > { %v1325_v49 = vpop.permute.xlu1 %1324  ;;  %1371 = vadd.xlane.f32.xlu0 %v1370_v43 }
 0x25b   : > { %2364 = vpow2.f32 %v1345_v57  ;;  %v1334_v61 = vsub.f32 %v2785_v3, %v1325_v49  ;;  %2225 = vmatmul.mubr.msk.bf16.vlgmr.msra.gmra.mxu0 %vm829_vm2, %v1464_v47 }
 0x25c   : > { %v2359_v51 = vpop.eup %2358  ;;  %2235 = vmatpush3.bf16.msra.mxu0 %v1591_v52  ;;  %2236 = vmatprep.mubr.msk.bf16.mxu0 %vm2493_vm3, %v2491_v58 }
 0x25d   : > { %v1349_v33 = vmul.f32 1.442695, %v1334_v61  ;;  %v1376_v62 = vsel %vm829_vm2, %v2359_v51, 0.0  ;;  %v1465_v34 = vpack.c.bf16 %v2359_v51, %v2355_v50  ;;  %v1357_v50 = vld [vmem:[#allocation4 + $0x30] sm:$0xff]  ;;  %v1358_v61 = vld [vmem:[#allocation4 + $0x38] sm:$0xff] }
 0x25e   : > { %1377 = vadd.xlane.f32.xlu1 %v1376_v62 }
 0x25f   : > { %2366 = vpow2.f32 %v1349_v33  ;;  %2231 = vmatmul.mubr.msk.bf16.vlgmr.msra.gmra.mxu1 %vm829_vm2, %v1465_v34 }
 0x260   : > { %v2361_v54 = vpop.eup %2360  ;;  %2241 = vmatpush3.bf16.msra.mxu1 %v1646_v37  ;;  %2242 = vmatprep.mubr.msk.bf16.mxu1 %vm2493_vm3, %v2491_v58  ;;  %v1273_v58 = vmul.f32 1.442695, %v1264_v22  ;;  %2368 = vpow2.f32 %v1271_v59 }
 0x261   : > { %v1379_v3 = vsel %vm829_vm2, %v2361_v54, 0.0 }
 0x262   : > { %1380 = vadd.xlane.f32.xlu0 %v1379_v3  ;;  %2370 = vpow2.f32 %v1273_v58 }
 0x263   : > { %2372 = vpow2.f32 %v1277_v0 }
 0x264   : > { %v2363_v52 = vpop.eup %2362  ;;  %2374 = vpow2.f32 %v1275_v9  ;;  %v1408_v9 = vld [vmem:[#allocation5] sm:$0xff] }
 0x265   : > { %v1385_v4 = vsel %vm829_vm2, %v2363_v52, 0.0  ;;  %2376 = vpow2.f32 %v1281_v11 }
 0x266   : > { %1386 = vadd.xlane.f32.xlu0 %v1385_v4  ;;  %2378 = vpow2.f32 %v1279_v13 }
 0x267   : > { %2380 = vpow2.f32 %v1285_v14  ;;  %v1409_v14 = vld [vmem:[#allocation5 + $0x8] sm:$0xff] }
 0x268   : > { %v2365_v38 = vpop.eup %2364  ;;  %2382 = vpow2.f32 %v1283_v12  ;;  %v1410_v12 = vld [vmem:[#allocation5 + $0x10] sm:$0xff] }
 0x269   : > { %v1382_v56 = vsel %vm829_vm2, %v2365_v38, 0.0  ;;  %v1466_v45 = vpack.c.bf16 %v2365_v38, %v2361_v54 }
 0x26a   : > { %1383 = vadd.xlane.f32.xlu1 %v1382_v56 }
 0x26b   : > { %2237 = vmatmul.mubr.msk.bf16.vlgmr.msra.gmra.mxu0 %vm829_vm2, %v1466_v45 }
 0x26c   : > { %v2367_v37 = vpop.eup %2366 }
 0x26d   : > { %v1388_v60 = vsel %vm829_vm2, %v2367_v37, 0.0  ;;  %v1467_v63 = vpack.c.bf16 %v2367_v37, %v2363_v52  ;;  %v2369_v16 = vpop.eup %2368 }
 0x26e   : > { %1389 = vadd.xlane.f32.xlu1 %v1388_v60  ;;  %v1359_v28 = vmul.f32 %v2369_v16, %v1351_v27 }
 0x26f   : > { %2243 = vmatmul.mubr.msk.bf16.vlgmr.msra.gmra.mxu1 %vm829_vm2, %v1467_v63  ;;  %v2371_v18 = vpop.eup %2370 }
 0x270   : > { %v2373_v19 = vpop.eup %2372  ;;  %v1360_v46 = vmul.f32 %v2371_v18, %v1352_v40 }
 0x271   : > { %v2375_v20 = vpop.eup %2374  ;;  %v1362_v6 = vmul.f32 %v2373_v19, %v1354_v1  ;;  %v1412_v1 = vld [vmem:[#allocation5 + $0x20] sm:$0xff] }
 0x272   : > { %v2377_v21 = vpop.eup %2376  ;;  %v1361_v36 = vmul.f32 %v2375_v20, %v1353_v29 }
 0x273   : > { %v2379_v22 = vpop.eup %2378  ;;  %v1364_v47 = vmul.f32 %v2377_v21, %v1356_v42 }
 0x274   : > { %v2381_v24 = vpop.eup %2380  ;;  %v1363_v48 = vmul.f32 %v2379_v22, %v1355_v10 }
 0x275   : > { %v2383_v26 = vpop.eup %2382  ;;  %v1366_v34 = vmul.f32 %v2381_v24, %v1358_v61 }
 0x276   : > { %v1365_v32 = vmul.f32 %v2383_v26, %v1357_v50 }
 0x27c   : > { %1418 = vperm.xlu0 %2338, %v2369_v16  }
 0x27f   : > { %1423 = vperm.xlu1 %2339, %v2371_v18  }
 0x280   : > { %1433 = vperm.xlu0 %2338, %v2373_v19  }
 0x283   : > { %1428 = vperm.xlu1 %2339, %v2375_v20  }
 0x284   : > { %1443 = vperm.xlu0 %2338, %v2377_v21  }
 0x287   : > { %1438 = vperm.xlu1 %2339, %v2379_v22  }
 0x288   : > { %1453 = vperm.xlu0 %2338, %v2381_v24  }
 0x28b   : > { %1448 = vperm.xlu1 %2339, %v2383_v26   ;;  %v1411_v26 = vld [vmem:[#allocation5 + $0x18] sm:$0xff] }
 0x2dd   : > { %v1369_v30 = vpop.xlane.xlu1 %1368 }
 0x2de   : > { %v1391_v35 = vadd.f32 %v1369_v30, %v1359_v28 }
 0x2df   : > { %v1375_v39 = vpop.xlane.xlu0 %1374 }
 0x2e0   : > { %1400 = vst.msk [vmem:[#allocation4] sm:$0xff] %vm812_vm4, %v1391_v35  ;;  %v1393_v41 = vadd.f32 %v1375_v39, %v1361_v36 }
 0x2e2   : > { %1402 = vst.msk [vmem:[#allocation4 + $0x10] sm:$0xff] %vm812_vm4, %v1393_v41 }
 0x2e3   : > { %v1372_v53 = vpop.xlane.xlu0 %1371 }
 0x2e4   : > { %v1392_v2 = vadd.f32 %v1372_v53, %v1360_v46 }
 0x2e6   : > { %1401 = vst.msk [vmem:[#allocation4 + $0x8] sm:$0xff] %vm812_vm4, %v1392_v2 }
 0x2e7   : > { %v1732_v8 = vld [vmem:[#allocation4] sm:$0xff]  ;;  %v1378_v44 = vpop.xlane.xlu1 %1377 }
 0x2e8   : > { %2384 = vrcp.f32 %v1732_v8  ;;  %v1394_v15 = vadd.f32 %v1378_v44, %v1362_v6  ;;  %v1413_v8 = vld [vmem:[#allocation5 + $0x28] sm:$0xff]  ;;  %v1414_v44 = vld [vmem:[#allocation5 + $0x30] sm:$0xff] }
 0x2e9   : > { %v1734_v17 = vld [vmem:[#allocation4 + $0x10] sm:$0xff] }
 0x2ea   : > { %1403 = vst.msk [vmem:[#allocation4 + $0x18] sm:$0xff] %vm812_vm4, %v1394_v15  ;;  %2386 = vrcp.f32 %v1734_v17 }
 0x2eb   : > { %v1381_v23 = vpop.xlane.xlu0 %1380 }
 0x2ec   : > { %v1395_v25 = vadd.f32 %v1381_v23, %v1363_v48 }
 0x2ed   : > { %v1733_v31 = vld [vmem:[#allocation4 + $0x8] sm:$0xff] }
 0x2ee   : > { %1404 = vst.msk [vmem:[#allocation4 + $0x20] sm:$0xff] %vm812_vm4, %v1395_v25  ;;  %2388 = vrcp.f32 %v1733_v31  ;;  %v1415_v31 = vld [vmem:[#allocation5 + $0x38] sm:$0xff] }
 0x2ef   : > { %v1387_v55 = vpop.xlane.xlu0 %1386 }
 0x2f0   : > { %v1397_v57 = vadd.f32 %v1387_v55, %v1365_v32 }
 0x2f1   : > { %v1735_v43 = vld [vmem:[#allocation4 + $0x18] sm:$0xff] }
 0x2f2   : > { %1406 = vst.msk [vmem:[#allocation4 + $0x30] sm:$0xff] %vm812_vm4, %v1397_v57  ;;  %2390 = vrcp.f32 %v1735_v43 }
 0x2f3   : > { %v1384_v49 = vpop.xlane.xlu1 %1383 }
 0x2f4   : > { %v1396_v33 = vadd.f32 %v1384_v49, %v1364_v47 }
 0x2f5   : > { %v2385_v51 = vpop.eup %2384  ;;  %v1736_v62 = vld [vmem:[#allocation4 + $0x20] sm:$0xff] }
 0x2f6   : > { %1750 = vperm.xlu1 %2339, %v2385_v51   ;;  %1405 = vst.msk [vmem:[#allocation4 + $0x28] sm:$0xff] %vm812_vm4, %v1396_v33  ;;  %2392 = vrcp.f32 %v1736_v62  ;;  %v1716_v62 = vld [vmem:[#allocation6] sm:$0xff] }
 0x2f7   : > { %v1390_v54 = vpop.xlane.xlu1 %1389  ;;  %v2387_v3 = vpop.eup %2386 }
 0x2f8   : > { %v1398_v52 = vadd.f32 %v1390_v54, %v1366_v34  ;;  %v1419_v11 = vpop.permute.xlu0 %1418 }
 0x2f9   : > { %v1738_v4 = vld [vmem:[#allocation4 + $0x30] sm:$0xff]  ;;  %v1456_v13 = vmul.f32 %v1419_v11, %v1408_v9  ;;  %v1719_v9 = vld [vmem:[#allocation6 + $0x18] sm:$0xff] }
 0x2fa   : > { %1760 = vperm.xlu1 %2339, %v2387_v3   ;;  %1407 = vst.msk [vmem:[#allocation4 + $0x38] sm:$0xff] %vm812_vm4, %v1398_v52  ;;  %2394 = vrcp.f32 %v1738_v4  ;;  %v1718_v4 = vld [vmem:[#allocation6 + $0x10] sm:$0xff] }
 0x2fb   : > { %v2389_v38 = vpop.eup %2388  ;;  %v1424_v0 = vpop.permute.xlu1 %1423 }
 0x2fc   : > { %1755 = vperm.xlu0 %2338, %v2389_v38   ;;  %v1457_v21 = vmul.f32 %v1424_v0, %v1409_v14  ;;  %v1434_v22 = vpop.permute.xlu0 %1433 }
 0x2fd   : > { %v1737_v56 = vld [vmem:[#allocation4 + $0x28] sm:$0xff]  ;;  %v1459_v39 = vmul.f32 %v1434_v22, %v1411_v26  ;;  %v1722_v22 = vld [vmem:[#allocation6 + $0x30] sm:$0xff] }
 0x2fe   : > { %2396 = vrcp.f32 %v1737_v56 }
 0x2ff   : > { %v2391_v45 = vpop.eup %2390  ;;  %v1429_v16 = vpop.permute.xlu1 %1428 }
 0x300   : > { %1765 = vperm.xlu0 %2338, %v2391_v45   ;;  %v1458_v24 = vmul.f32 %v1429_v16, %v1410_v12  ;;  %v1444_v2 = vpop.permute.xlu0 %1443  ;;  %v1720_v16 = vld [vmem:[#allocation6 + $0x20] sm:$0xff] }
 0x301   : > { %v1739_v59 = vld [vmem:[#allocation4 + $0x38] sm:$0xff]  ;;  %v1461_v23 = vmul.f32 %v1444_v2, %v1413_v8 }
 0x302   : > { %2398 = vrcp.f32 %v1739_v59 }
 0x303   : > { %v2393_v37 = vpop.eup %2392  ;;  %v1439_v46 = vpop.permute.xlu1 %1438 }
 0x304   : > { %1770 = vperm.xlu1 %2339, %v2393_v37   ;;  %v1460_v6 = vmul.f32 %v1439_v46, %v1412_v1  ;;  %v1454_v50 = vpop.permute.xlu0 %1453  ;;  %v1717_v37 = vld [vmem:[#allocation6 + $0x8] sm:$0xff] }
 0x305   : > { %v1463_v49 = vmul.f32 %v1454_v50, %v1415_v31 }
 0x307   : > { %v2395_v58 = vpop.eup %2394  ;;  %v1449_v10 = vpop.permute.xlu1 %1448 }
 0x308   : > { %1780 = vperm.xlu1 %2339, %v2395_v58   ;;  %v1462_v25 = vmul.f32 %v1449_v10, %v1414_v44 }
 0x30b   : > { %v2397_v60 = vpop.eup %2396 }
 0x30c   : > { %1775 = vperm.xlu0 %2338, %v2397_v60  }
 0x30f   : > { %v2399_v63 = vpop.eup %2398 }
 0x310   : > { %1785 = vperm.xlu0 %2338, %v2399_v63  }
 0x31b   : > { %v1517_v18 = vpop.f32.mrf.mxu0 }
 0x31c   : > { %v1689_v19 = vadd.f32 %v1517_v18, %v1456_v13 }
 0x31d   : > { %v2226_v20 = vpop.f32.mrf.mxu0 }
 0x31e   : > { %1697 = vst.msk [vmem:[#allocation5] sm:$0xff] %vm829_vm2, %v1689_v19 }
 0x31f   : > { %v1520_v27 = vpop.f32.mrf.mxu0  ;;  %v1572_v28 = vpop.f32.mrf.mxu1 }
 0x320   : > { %v1690_v29 = vadd.f32 %v1520_v27, %v1457_v21  ;;  %v1691_v30 = vadd.f32 %v1572_v28, %v1458_v24 }
 0x321   : > { %v2227_v35 = vpop.f32.mrf.mxu0  ;;  %v2232_v36 = vpop.f32.mrf.mxu1 }
 0x322   : > { %1698 = vst.msk [vmem:[#allocation5 + $0x8] sm:$0xff] %vm829_vm2, %v1690_v29  ;;  %1699 = vst.msk [vmem:[#allocation5 + $0x10] sm:$0xff] %vm829_vm2, %v1691_v30  ;;  %v1721_v29 = vld [vmem:[#allocation6 + $0x28] sm:$0xff] }
 0x323   : > { %v1575_v40 = vpop.f32.mrf.mxu1 }
 0x324   : > { %v1692_v41 = vadd.f32 %v1575_v40, %v1459_v39  ;;  %v1723_v40 = vld [vmem:[#allocation6 + $0x38] sm:$0xff] }
 0x325   : > { %v2233_v53 = vpop.f32.mrf.mxu1  ;;  %v1724_v34 = vld [vmem:[#allocation5] sm:$0xff] }
 0x326   : > { %1700 = vst.msk [vmem:[#allocation5 + $0x18] sm:$0xff] %vm829_vm2, %v1692_v41 }
 0x329   : > { %v1726_v38 = vld [vmem:[#allocation5 + $0x10] sm:$0xff]  ;;  %v1725_v58 = vld [vmem:[#allocation5 + $0x8] sm:$0xff] }
 0x32b   : > { %v1627_v15 = vpop.f32.mrf.mxu0 }
 0x32c   : > { %v1693_v17 = vadd.f32 %v1627_v15, %v1460_v6 }
 0x32d   : > { %v2238_v48 = vpop.f32.mrf.mxu0  ;;  %v1727_v11 = vld [vmem:[#allocation5 + $0x18] sm:$0xff] }
 0x32e   : > { %1701 = vst.msk [vmem:[#allocation5 + $0x20] sm:$0xff] %vm829_vm2, %v1693_v17 }
 0x32f   : > { %v1630_v32 = vpop.f32.mrf.mxu0  ;;  %v1682_v55 = vpop.f32.mrf.mxu1 }
 0x330   : > { %v1694_v42 = vadd.f32 %v1630_v32, %v1461_v23  ;;  %v1695_v57 = vadd.f32 %v1682_v55, %v1462_v25 }
 0x331   : > { %v2239_v43 = vpop.f32.mrf.mxu0  ;;  %v2244_v47 = vpop.f32.mrf.mxu1 }
 0x332   : > { %1702 = vst.msk [vmem:[#allocation5 + $0x28] sm:$0xff] %vm829_vm2, %v1694_v42  ;;  %1703 = vst.msk [vmem:[#allocation5 + $0x30] sm:$0xff] %vm829_vm2, %v1695_v57 }
 0x333   : > { %v1685_v61 = vpop.f32.mrf.mxu1 }
 0x334   : > { %v1696_v51 = vadd.f32 %v1685_v61, %v1463_v49 }
 0x335   : > { %v2245_v33 = vpop.f32.mrf.mxu1  ;;  %v1728_v18 = vld [vmem:[#allocation5 + $0x20] sm:$0xff] }
 0x336   : > { %1704 = vst.msk [vmem:[#allocation5 + $0x38] sm:$0xff] %vm829_vm2, %v1696_v51 }
 0x339   : > { %v1730_v24 = vld [vmem:[#allocation5 + $0x30] sm:$0xff]  ;;  %v1729_v30 = vld [vmem:[#allocation5 + $0x28] sm:$0xff] }
 0x33d   : > { %v1731_v41 = vld [vmem:[#allocation5 + $0x38] sm:$0xff] }
 0x371   : > { %v1751_v54 = vpop.permute.xlu1 %1750 }
 0x372   : > { %v1788_v3 = vmul.f32 %v1751_v54, %v1724_v34 }
 0x374   : > { %v1796_v52 = vadd.f32 %v1788_v3, %v1716_v62 }
 0x375   : > { %v1761_v56 = vpop.permute.xlu1 %1760 }
 0x376   : > { %1804 = vst.msk [vmem:[#allocation6] sm:$0xff] %vm829_vm2, %v1796_v52  ;;  %v1790_v45 = vmul.f32 %v1761_v56, %v1726_v38 }
 0x377   : > { %v1756_v60 = vpop.permute.xlu0 %1755 }
 0x378   : > { %v1798_v59 = vadd.f32 %v1790_v45, %v1718_v4  ;;  %v1789_v63 = vmul.f32 %v1756_v60, %v1725_v58 }
 0x37a   : > { %1806 = vst.msk [vmem:[#allocation6 + $0x10] sm:$0xff] %vm829_vm2, %v1798_v59  ;;  %v1797_v0 = vadd.f32 %v1789_v63, %v1717_v37 }
 0x37b   : > { %v1766_v13 = vpop.permute.xlu0 %1765 }
 0x37c   : > { %1805 = vst.msk [vmem:[#allocation6 + $0x8] sm:$0xff] %vm829_vm2, %v1797_v0  ;;  %v1791_v14 = vmul.f32 %v1766_v13, %v1727_v11  ;;  %v2497_v13 = vmov (%p1812_p1), 0.0  }
 0x37d   : > { %v1817_v2 = vld [vmem:[#allocation6] sm:$0xff] (%p1812_p1) }
 0x37e   : > { %v1799_v12 = vadd.f32 %v1791_v14, %v1719_v9 }
 0x37f   : > { %v1771_v19 = vpop.permute.xlu1 %1770 }
 0x380   : > { %1807 = vst.msk [vmem:[#allocation6 + $0x18] sm:$0xff] %vm829_vm2, %v1799_v12  ;;  %v1792_v20 = vmul.f32 %v1771_v19, %v1728_v18 }
 0x381   : > { %v1819_v6 = vld [vmem:[#allocation6 + $0x10] sm:$0xff] (%p1812_p1) }
 0x382   : > { %v1800_v21 = vadd.f32 %v1792_v20, %v1720_v16 }
 0x383   : > { %v1781_v26 = vpop.permute.xlu1 %1780  ;;  %v1818_v17 = vld [vmem:[#allocation6 + $0x8] sm:$0xff] (%p1812_p1) }
 0x384   : > { %1808 = vst.msk [vmem:[#allocation6 + $0x20] sm:$0xff] %vm829_vm2, %v1800_v21  ;;  %v1794_v27 = vmul.f32 %v1781_v26, %v1730_v24 }
 0x386   : > { %v1802_v28 = vadd.f32 %v1794_v27, %v1722_v22 }
 0x387   : > { %v1776_v35 = vpop.permute.xlu0 %1775  ;;  %v1820_v48 = vld [vmem:[#allocation6 + $0x18] sm:$0xff] (%p1812_p1) }
 0x388   : > { %1810 = vst.msk [vmem:[#allocation6 + $0x30] sm:$0xff] %vm829_vm2, %v1802_v28  ;;  %v1793_v36 = vmul.f32 %v1776_v35, %v1729_v30 }
 0x38a   : > { %v1801_v39 = vadd.f32 %v1793_v36, %v1721_v29 }
 0x38b   : > { %v1786_v46 = vpop.permute.xlu0 %1785  ;;  %v1821_v8 = vld [vmem:[#allocation6 + $0x20] sm:$0xff] (%p1812_p1) }
 0x38c   : > { %1809 = vst.msk [vmem:[#allocation6 + $0x28] sm:$0xff] %vm829_vm2, %v1801_v39  ;;  %v1795_v53 = vmul.f32 %v1786_v46, %v1731_v41  ;;  %1816 = sbr.rel (!%p1812_p1) target bundleno = 934 (0x3a6), region = 171  ;;  %v1825_v10 = vcombine.low (%p1812_p1), %v1817_v2, %v1821_v8  ;;  %v1826_v15 = vcombine.high (%p1812_p1), %v1817_v2, %v1821_v8 }
 0x38e   : > { %v1803_v1 = vadd.f32 %v1795_v53, %v1723_v40  ;;  %v1833_v32 = vrot.slane (%p1812_p1), %v1825_v10, %v2703_v7  ;;  %v1840_v55 = vrot.slane (%p1812_p1), %v1826_v15, %v2703_v7 }
 0x38f   : > { %v1823_v44 = vld [vmem:[#allocation6 + $0x30] sm:$0xff] (%p1812_p1) }
 0x390   : > { %1811 = vst.msk [vmem:[#allocation6 + $0x38] sm:$0xff] %vm829_vm2, %v1803_v1  ;;  %v1841_v23 = vcombine.low (%p1812_p1), %v1819_v6, %v1823_v44  ;;  %v1842_v50 = vcombine.high (%p1812_p1), %v1819_v6, %v1823_v44 }
 0x392   : > { %v1849_v43 = vrot.slane %v1841_v23, %v2703_v7  ;;  %v1856_v47 = vrot.slane %v1842_v50, %v2703_v7 }
 0x393   : > { %v1822_v25 = vld [vmem:[#allocation6 + $0x28] sm:$0xff] }
 0x394   : > { %v1893_v42 = vcombine.low %v1818_v17, %v1822_v25  ;;  %v1894_v49 = vcombine.high %v1818_v17, %v1822_v25  ;;  %v1857_v62 = vcombine.low %v1833_v32, %v1849_v43  ;;  %v1858_v34 = vcombine.high %v1833_v32, %v1849_v43 }
 0x395   : > { %v1873_v54 = vcombine.low %v1840_v55, %v1856_v47  ;;  %v1874_v3 = vcombine.high %v1840_v55, %v1856_v47 }
 0x396   : > { %v1901_v51 = vrot.slane %v1893_v42, %v2703_v7  ;;  %v1908_v38 = vrot.slane %v1894_v49, %v2703_v7  ;;  %v1865_v45 = vrot.slane %v1857_v62, %v2701_v5  ;;  %v1872_v59 = vrot.slane %v1858_v34, %v2701_v5 }
 0x397   : > { %v1824_v31 = vld [vmem:[#allocation6 + $0x38] sm:$0xff]  ;;  %v1881_v37 = vrot.slane %v1873_v54, %v2701_v5  ;;  %v1888_v58 = vrot.slane %v1874_v3, %v2701_v5 }
 0x398   : > { %v1909_v57 = vcombine.low %v1820_v48, %v1824_v31  ;;  %v1910_v61 = vcombine.high %v1820_v48, %v1824_v31  ;;  %v1961_v11 = vpack.c.bf16 %v1865_v45, %v1865_v45  ;;  %v1963_v14 = vpack.c.bf16 %v1872_v59, %v1872_v59 }
 0x399   : > { %v1890_v12 = vcombine.high %v1872_v59, %v2497_v13  ;;  %v1965_v16 = vpack.c.bf16 %v1881_v37, %v1881_v37  ;;  %v1891_v18 = vcombine.high %v1881_v37, %v2497_v13  ;;  %v1967_v19 = vpack.c.bf16 %v1888_v58, %v1888_v58 }
 0x39a   : > { %v1917_v33 = vrot.slane %v1909_v57, %v2703_v7  ;;  %v1924_v56 = vrot.slane %v1910_v61, %v2703_v7  ;;  %v1889_v7 = vcombine.high %v1865_v45, %v2497_v13  ;;  %v1892_v20 = vcombine.high %v1888_v58, %v2497_v13  ;;  %1978 = vst.msk [vmem:[%s2649_s11] sm:$0x3] %vm1977_vm6, %v1961_v11 }
 0x39b   : > { %1980 = vst.msk [vmem:[%s2649_s11 + $0x4] sm:$0x3] %vm1977_vm6, %v1963_v14  ;;  %v1964_v22 = vpack.c.bf16 %v1890_v12, %v1890_v12  ;;  %1982 = vst.msk [vmem:[%s2649_s11 + $0x8] sm:$0x3] %vm1977_vm6, %v1965_v16  ;;  %v1966_v27 = vpack.c.bf16 %v1891_v18, %v1891_v18 }
 0x39c   : > { %v1925_v52 = vcombine.low %v1901_v51, %v1917_v33  ;;  %v1926_v4 = vcombine.high %v1901_v51, %v1917_v33  ;;  %v1941_v0 = vcombine.low %v1908_v38, %v1924_v56  ;;  %v1942_v9 = vcombine.high %v1908_v38, %v1924_v56  ;;  %1984 = vst.msk [vmem:[%s2649_s11 + $0xc] sm:$0x3] %vm1977_vm6, %v1967_v19 }
 0x39d   : > { %v1962_v21 = vpack.c.bf16 %v1889_v7, %v1889_v7  ;;  %v1968_v28 = vpack.c.bf16 %v1892_v20, %v1892_v20  ;;  %1981 = vst.msk [vmem:[%s2649_s11 + $0x6] sm:$0x3] %vm1977_vm6, %v1964_v22  ;;  %1983 = vst.msk [vmem:[%s2649_s11 + $0xa] sm:$0x3] %vm1977_vm6, %v1966_v27 }
 0x39e   : > { %v1933_v60 = vrot.slane %v1925_v52, %v2701_v5  ;;  %v1940_v63 = vrot.slane %v1926_v4, %v2701_v5  ;;  %v1949_v36 = vrot.slane %v1941_v0, %v2701_v5  ;;  %v1956_v39 = vrot.slane %v1942_v9, %v2701_v5 }
 0x39f   : > { %1979 = vst.msk [vmem:[%s2649_s11 + $0x2] sm:$0x3] %vm1977_vm6, %v1962_v21  ;;  %1985 = vst.msk [vmem:[%s2649_s11 + $0xe] sm:$0x3] %vm1977_vm6, %v1968_v28 }
 0x3a0   : > { %v1969_v24 = vpack.c.bf16 %v1933_v60, %v1933_v60  ;;  %v1957_v26 = vcombine.high %v1933_v60, %v2497_v13  ;;  %v1971_v29 = vpack.c.bf16 %v1940_v63, %v1940_v63  ;;  %v1958_v30 = vcombine.high %v1940_v63, %v2497_v13 }
 0x3a1   : > { %v1973_v41 = vpack.c.bf16 %v1949_v36, %v1949_v36  ;;  %v1959_v46 = vcombine.high %v1949_v36, %v2497_v13  ;;  %v1975_v53 = vpack.c.bf16 %v1956_v39, %v1956_v39  ;;  %v1960_v1 = vcombine.high %v1956_v39, %v2497_v13 }
 0x3a2   : > { %1986 = vst.msk [vmem:[%s2649_s11 + $0x10] sm:$0x3] %vm1977_vm6, %v1969_v24  ;;  %v1970_v35 = vpack.c.bf16 %v1957_v26, %v1957_v26  ;;  %1988 = vst.msk [vmem:[%s2649_s11 + $0x14] sm:$0x3] %vm1977_vm6, %v1971_v29  ;;  %v1972_v40 = vpack.c.bf16 %v1958_v30, %v1958_v30 }
 0x3a3   : > { %1990 = vst.msk [vmem:[%s2649_s11 + $0x18] sm:$0x3] %vm1977_vm6, %v1973_v41  ;;  %v1974_v2 = vpack.c.bf16 %v1959_v46, %v1959_v46  ;;  %1992 = vst.msk [vmem:[%s2649_s11 + $0x1c] sm:$0x3] %vm1977_vm6, %v1975_v53  ;;  %v1976_v5 = vpack.c.bf16 %v1960_v1, %v1960_v1 }
 0x3a4   : > { %1987 = vst.msk [vmem:[%s2649_s11 + $0x12] sm:$0x3] %vm1977_vm6, %v1970_v35  ;;  %1989 = vst.msk [vmem:[%s2649_s11 + $0x16] sm:$0x3] %vm1977_vm6, %v1972_v40 }
 0x3a5   : > { %1991 = vst.msk [vmem:[%s2649_s11 + $0x1a] sm:$0x3] %vm1977_vm6, %v1974_v2  ;;  %1993 = vst.msk [vmem:[%s2649_s11 + $0x1e] sm:$0x3] %vm1977_vm6, %v1976_v5 }
 0x3a6 PF: > { %s13_s20 = sadd.s32 1, %s2486_s20   ;;  %s3043_s12 = smov %s2458_s13 }
 0x3a7   : > { %p10_p2 = scmp.ge.s32.totalorder %s13_s20, 6   ;;  %s3044_s13 = smov %s2598_s7 }
 0x3a8   : > { %s3045_s14 = smov %s2466_s15  ;;  %s3046_s15 = smov %s2595_s6 }
 0x3a9   : > { %s3047_s16 = smov %s2478_s18  ;;  %s3048_s17 = smov %s2482_s19 }
 0x3aa   : > { %s3049_s18 = smov %s3052_s21  ;;  %s3050_s19 = smov %s3056_s22 }
 0x3ab   :  { %12 = sbr.rel (!%p10_p2) target bundleno = 5 (0x5), region = 222 }

</bundles_post_ra>
